<compile_context>
chip_gen: v7x
topology: tpu7x:2x2x1
jax: 0.10.0
libtpu: 0.0.40
codegen_flags: <defaults>
</compile_context>

<pallas_src>
import math
import functools

import jax
import jax.numpy as jnp
from jax.experimental import pallas as pl
from jax.experimental.pallas import tpu as pltpu


def _sde_chunk_kernel(mucT_ref, invcT_ref, muc_ref, invc_ref, bias_ref,
                      x0_ref, noise_ref, traj_ref, x_state,
                      *, eps, n_steps, chunk, d):
    """One (batch-tile, time-chunk) grid step of Euler–Maruyama integration.

    Trajectory index m = c*chunk + j: write x_m into the batch-major output
    chunk at lanes [j*d, (j+1)*d), then (if m < n_steps) advance x_m -> x_{m+1}
    using the precomputed per-step GMM tables and the matching noise lanes.
    """
    c = pl.program_id(1)          # time-chunk index (sequential, "arbitrary")

    # (Re-)initialize the carried state at the first time chunk of each batch tile.
    @pl.when(c == 0)
    def _():
        x_state[...] = x0_ref[...]

    dt = 1.0 / n_steps
    drift_scale = eps * dt                        # multiplies grad-log-density
    noise_scale = math.sqrt(eps) * math.sqrt(dt)  # sqrt(eps) * sqrt(delta_t)

    # Fully unrolled chunk loop: j static => static lane offsets everywhere,
    # and static indexing into the per-step tables.
    for j in range(chunk):
        m = c * chunk + j                         # global step / trajectory index
        x = x_state[...]                          # (bB, D) = x_m
        traj_ref[:, j * d:(j + 1) * d] = x        # trajectory[:, m, :] = x_m

        @pl.when(m < n_steps)
        def _(j=j, x=x):
            mucT = mucT_ref[j]                    # (D, K)   (mu/c(t))^T
            invcT = invcT_ref[j]                  # (D, K)   (1/c(t))^T
            muc = muc_ref[j]                      # (K, D)   mu/c(t)
            invc = invc_ref[j]                    # (K, D)   1/c(t)
            bias = bias_ref[j]                    # (1, K)   per-component const

            # logits_bk = bias_k + x@(mu/c)^T - 0.5 * x^2@(1/c)^T        (MXU)
            logits = (jnp.dot(x, mucT, preferred_element_type=jnp.float32)
                      - 0.5 * jnp.dot(x * x, invcT,
                                      preferred_element_type=jnp.float32)
                      + bias)                                            # (bB, K)

            # responsibilities (max-stabilized softmax over mixture components)
            mmax = jnp.max(logits, axis=-1, keepdims=True)
            e = jnp.exp(logits - mmax)
            denom = jnp.sum(e, axis=-1, keepdims=True)
            inv = pl.reciprocal(denom, approx=True)
            inv = inv * (2.0 - denom * inv)       # one Newton step (exactness)
            r = e * inv

            # grad-log-density = r@(mu/c) - x * (r@(1/c))                (MXU)
            drift_term = (jnp.dot(r, muc, preferred_element_type=jnp.float32)
                          - x * jnp.dot(r, invc,
                                        preferred_element_type=jnp.float32))

            # Euler–Maruyama update: x <- x + eps*grad*dt + sqrt(eps*dt)*randn
            nz = noise_ref[:, j * d:(j + 1) * d]
            x_state[...] = x + drift_scale * drift_term + noise_scale * nz


def _detect_cores_and_vmem():
    """Best-effort (TensorCores per device, VMEM bytes per core)."""
    cores, vmem = 1, 64 << 20                     # conservative v7x defaults
    try:
        info = pltpu.get_tpu_info()
        vmem = int(getattr(info, "vmem_capacity_bytes", vmem))
        for name in ("num_cores", "core_count", "num_tensorcores",
                     "tensorcore_count", "num_cores_per_chip"):
            v = getattr(info, name, None)
            if v:
                cores = max(cores, int(v))
                break
    except Exception:
        pass
    if cores == 1:
        try:
            kind = jax.devices()[0].device_kind.lower()
            if "7" in kind:                       # v7x exposes 2 TCs per chip
                cores = 2
        except Exception:
            pass
    return cores, vmem


def ground_truth_sde_forward(x, probs, mus, sigmas, eps, n_steps, noise,
                             *, time_chunk=32, batch_tile=256):
    """Returns (trajectory (B, n_steps+1, D), t_storage (n_steps+1, B, 1)).

    `noise` is the pre-drawn per-step Gaussian noise in batch-major layout
    (B, n_steps, D) (the reference module draws fresh randn each step).
    """
    B, D = x.shape
    K = int(probs.reshape(-1).shape[0])
    n_steps = int(n_steps)
    eps = float(eps)
    assert noise.shape == (B, n_steps, D)

    num_cores, vmem_cap = _detect_cores_and_vmem()

    # ---- time chunking: blocks are lane-flattened (bB, T*D); need T*D % 128 == 0
    t_unit = 128 // math.gcd(D, 128)
    if n_steps + 1 <= max(time_chunk, t_unit):
        T = n_steps + 1                           # single chunk == full arrays
        single_chunk = True
    else:
        T = max(t_unit, (time_chunk // t_unit) * t_unit)
        single_chunk = False
    n_chunks = -(-(n_steps + 1) // T)

    # ---- batch tiling (ensure >= num_cores parallel tiles on multi-TC chips)
    if B <= 8:
        bB = B
    else:
        bB = min(max(8, (batch_tile // 8) * 8), (B // 8) * 8)
        if num_cores > 1 and B >= 16:
            per_core = ((-(-B // num_cores) + 7) // 8) * 8
            bB = min(bB, per_core)
    n_btiles = -(-B // bB)

    # ---- hoisted time-only tables (computed once in XLA, tiny) -------------
    probs_f = probs.reshape(-1).astype(jnp.float32)
    mus_f = mus.astype(jnp.float32)               # (K, D)
    sig_f = sigmas.astype(jnp.float32)            # (K, D) diag(Sigma_k)
    log_w = jnp.log(probs_f)                      # (K,)

    P = n_chunks * T
    dt = 1.0 / n_steps
    idx = jnp.arange(P, dtype=jnp.float32)
    t_clamped = jnp.minimum(idx, float(n_steps - 1)) * dt     # padded steps safe
    c_t = eps * (sig_f[None] + (1.0 - t_clamped)[:, None, None])   # (P, K, D)
    inv_c = 1.0 / c_t                                               # (P, K, D)
    mu_over_c = mus_f[None] * inv_c                                 # (P, K, D)
    bias = (log_w[None, :] - 0.5 * jnp.sum(
        mus_f[None] * mu_over_c + jnp.log(2.0 * math.pi * c_t), axis=-1))   # (P,K)
    bias = bias[:, None, :]                                         # (P, 1, K)
    mucT = jnp.transpose(mu_over_c, (0, 2, 1))                      # (P, D, K)
    invcT = jnp.transpose(inv_c, (0, 2, 1))                         # (P, D, K)

    # ---- operand layout: batch-major, lane-flattened (free reshapes) --------
    x0 = x.astype(jnp.float32)
    noise_flat = noise.astype(jnp.float32).reshape(B, n_steps * D)
    if single_chunk and T * D > n_steps * D:
        # single-chunk blocks must equal the full array dims -> pad noise cols
        noise_flat = jnp.pad(noise_flat, ((0, 0), (0, T * D - n_steps * D)))

    kernel = functools.partial(_sde_chunk_kernel,
                               eps=eps, n_steps=n_steps, chunk=T, d=D)

    # ---- VMEM budget (generation-aware cap) ---------------------------------
    def _blk_bytes(shape):
        s = list(shape)
        s[-1] = -(-s[-1] // 128) * 128
        if len(s) >= 2:
            s[-2] = -(-s[-2] // 8) * 8
        return 4 * math.prod(s)

    est = 2 * (2 * _blk_bytes((T, K, D)) + 2 * _blk_bytes((T, D, K))
               + _blk_bytes((T, 1, K)) + _blk_bytes((bB, D))
               + 2 * _blk_bytes((bB, T * D)))
    est += _blk_bytes((bB, D))                    # carried-state scratch
    vmem_limit = int(min(max(32 << 20, est + (8 << 20)), vmem_cap - (8 << 20)))
    vmem_limit = max(vmem_limit, 16 << 20)

    grid_spec = pltpu.PrefetchScalarGridSpec(
        num_scalar_prefetch=0,
        grid=(n_btiles, n_chunks),
        in_specs=[
            pl.BlockSpec((T, D, K), lambda b, c: (c, 0, 0)),   # (mu/c)^T table
            pl.BlockSpec((T, D, K), lambda b, c: (c, 0, 0)),   # (1/c)^T table
            pl.BlockSpec((T, K, D), lambda b, c: (c, 0, 0)),   # mu/c table
            pl.BlockSpec((T, K, D), lambda b, c: (c, 0, 0)),   # 1/c table
            pl.BlockSpec((T, 1, K), lambda b, c: (c, 0, 0)),   # bias table
            pl.BlockSpec((bB, D), lambda b, c: (b, 0)),        # x0 batch tile
            pl.BlockSpec((bB, T * D), lambda b, c: (b, c)),    # noise chunk
        ],
        out_specs=pl.BlockSpec((bB, T * D), lambda b, c: (b, c)),  # traj chunk
        scratch_shapes=[pltpu.VMEM((bB, D), jnp.float32)],         # carried x
    )

    traj_flat = pl.pallas_call(
        kernel,
        out_shape=jax.ShapeDtypeStruct((B, (n_steps + 1) * D), jnp.float32),
        grid_spec=grid_spec,
        compiler_params=pltpu.CompilerParams(
            dimension_semantics=("parallel", "arbitrary"),
            vmem_limit_bytes=vmem_limit),
    )(mucT, invcT, mu_over_c, inv_c, bias, x0, noise_flat)

    # Batch-major already; row-major reshape is free (no extra HBM pass).
    trajectory = traj_flat.reshape(B, n_steps + 1, D)

    # t_storage = [zeros(1)] + [i/n_steps for i in range(n_steps)], repeated over B.
    t_vals = jnp.concatenate([jnp.zeros((1,), jnp.float32),
                              jnp.arange(n_steps, dtype=jnp.float32) / n_steps])
    t_out = jnp.broadcast_to(t_vals[:, None, None], (n_steps + 1, B, 1))
    return trajectory, t_out


def _reference_forward(x, probs, mus, sigmas, eps, n_steps, noise):
    """Pure-JAX reference (broadcast formulation, exact arithmetic).

    noise is batch-major (B, n_steps, D)."""
    dt = 1.0 / n_steps
    ns = math.sqrt(eps) * math.sqrt(dt)
    log_w = jnp.log(probs.reshape(1, -1))
    traj = [x]
    for i in range(n_steps):
        t = i * dt
        c = eps * (sigmas + (1.0 - t))                         # (K, D)
        diff = x[:, None, :] - mus[None, :, :]                 # (B, K, D)
        quad = diff * diff / c[None] + jnp.log(2.0 * math.pi * c)[None]
        logits = log_w - 0.5 * jnp.sum(quad, axis=-1)          # (B, K)
        r = jax.nn.softmax(logits, axis=-1)
        drift = eps * jnp.sum(r[:, :, None] * (-diff / c[None]), axis=1)
        x = x + drift * dt + ns * noise[:, i]
        traj.append(x)
    return jnp.stack(traj, axis=1)                             # (B, n_steps+1, D)


if __name__ == "__main__":
    # Small deterministic config: 2 batch tiles x 3 time chunks, with a
    # partial edge chunk ((n_steps+1) % T != 0) to exercise output masking.
    B, D, K = 16, 16, 4
    eps = 0.1
    n_steps = 19
    time_chunk = 8          # T*D = 128 -> lane-dense chunk blocks
    batch_tile = 8

    key = jax.random.PRNGKey(0)
    k_x, k_p, k_m, k_s, k_n = jax.random.split(key, 5)

    # Deterministic "potential" parameters (diagonal GMM).
    probs = jax.nn.softmax(jax.random.normal(k_p, (K,), jnp.float32))
    mus = 2.0 * jax.random.normal(k_m, (K, D), jnp.float32)
    sigmas = 0.5 * jnp.exp(0.3 * jax.random.normal(k_s, (K, D), jnp.float32)) + 0.1

    x0 = jax.random.normal(k_x, (B, D), jnp.float32)

    # Pre-drawn per-step noise, batch-major (matches the kernel's HBM layout).
    noise = jax.random.normal(k_n, (B, n_steps, D), jnp.float32)

    trajectory, t_storage = ground_truth_sde_forward(
        x0, probs, mus, sigmas, eps, n_steps, noise,
        time_chunk=time_chunk, batch_tile=batch_tile)
    trajectory = jax.block_until_ready(trajectory)
    t_storage = jax.block_until_ready(t_storage)

    assert trajectory.shape == (B, n_steps + 1, D)
    assert t_storage.shape == (n_steps + 1, B, 1)
    assert bool(jnp.all(jnp.isfinite(trajectory)))
    assert bool(jnp.all(jnp.isfinite(t_storage)))

    # Numerical check against the pure-JAX reference of the same drift.
    traj_ref = jax.block_until_ready(
        _reference_forward(x0, probs, mus, sigmas, eps, n_steps, noise))
    assert bool(jnp.allclose(trajectory, traj_ref, rtol=2e-3, atol=2e-3)), (
        float(jnp.max(jnp.abs(trajectory - traj_ref))))

    print("KERNEL_OK")
</pallas_src>

<mosaic_0001>
module attributes {stable_mosaic.version = 11 : i64} {
  func.func @_sde_chunk_kernel(%arg0: i32, %arg1: i32, %arg2: memref<8x16x4xf32, #tpu.memory_space<vmem>>, %arg3: memref<8x16x4xf32, #tpu.memory_space<vmem>>, %arg4: memref<8x4x16xf32, #tpu.memory_space<vmem>>, %arg5: memref<8x4x16xf32, #tpu.memory_space<vmem>>, %arg6: memref<8x1x4xf32, #tpu.memory_space<vmem>>, %arg7: memref<8x16xf32, #tpu.memory_space<vmem>>, %arg8: memref<8x128xf32, #tpu.memory_space<vmem>>, %arg9: memref<8x128xf32, #tpu.memory_space<vmem>>, %arg10: memref<8x16xf32, #tpu.memory_space<vmem>>) attributes {dimension_semantics = [#tpu.dimension_semantics<parallel>, #tpu.dimension_semantics<arbitrary>], iteration_bounds = array<i64: 2, 3>, scalar_prefetch = 0 : i64, scratch_operands = 1 : i64, tpu.core_type = #tpu.core_type<tc>, window_params = [{transform_indices = @transform_0, window_bounds = array<i64: 8, 16, 4>}, {transform_indices = @transform_1, window_bounds = array<i64: 8, 16, 4>}, {transform_indices = @transform_2, window_bounds = array<i64: 8, 4, 16>}, {transform_indices = @transform_3, window_bounds = array<i64: 8, 4, 16>}, {transform_indices = @transform_4, window_bounds = array<i64: 8, 1, 4>}, {transform_indices = @transform_5, window_bounds = array<i64: 8, 16>}, {transform_indices = @transform_6, window_bounds = array<i64: 8, 128>}, {transform_indices = @transform_7, window_bounds = array<i64: 8, 128>}]} {
    %c0_i32 = arith.constant 0 : i32
    %0 = arith.cmpi eq, %arg1, %c0_i32 : i32
    %1 = arith.extui %0 : i1 to i32
    %c0_i32_0 = arith.constant 0 : i32
    %2 = arith.cmpi ne, %1, %c0_i32_0 : i32
    scf.if %2 {
      %c0_48 = arith.constant 0 : index
      %c0_49 = arith.constant 0 : index
      %59 = vector.load %arg7[%c0_48, %c0_49] : memref<8x16xf32, #tpu.memory_space<vmem>>, vector<8x16xf32>
      %c0_50 = arith.constant 0 : index
      %c0_51 = arith.constant 0 : index
      %60 = vector.load %arg10[%c0_50, %c0_51] : memref<8x16xf32, #tpu.memory_space<vmem>>, vector<8x16xf32>
      tpu.vector_store %arg10[%c0_50, %c0_51], %59 {strides = array<i32>} : memref<8x16xf32, #tpu.memory_space<vmem>>, vector<8x16xf32>,
    } else {
    }
    %c8_i32 = arith.constant 8 : i32
    %3 = arith.muli %arg1, %c8_i32 : i32
    %c0_i32_1 = arith.constant 0 : i32
    %4 = arith.addi %3, %c0_i32_1 : i32
    %c0 = arith.constant 0 : index
    %c0_2 = arith.constant 0 : index
    %5 = vector.load %arg10[%c0, %c0_2] : memref<8x16xf32, #tpu.memory_space<vmem>>, vector<8x16xf32>
    %c0_3 = arith.constant 0 : index
    %c0_4 = arith.constant 0 : index
    %6 = vector.load %arg9[%c0_3, %c0_4] : memref<8x128xf32, #tpu.memory_space<vmem>>, vector<8x16xf32>
    tpu.vector_store %arg9[%c0_3, %c0_4], %5 {strides = array<i32>} : memref<8x128xf32, #tpu.memory_space<vmem>>, vector<8x16xf32>,
    %c19_i32 = arith.constant 19 : i32
    %7 = arith.cmpi slt, %4, %c19_i32 : i32
    %8 = arith.extui %7 : i1 to i32
    %c0_i32_5 = arith.constant 0 : i32
    %9 = arith.cmpi ne, %8, %c0_i32_5 : i32
    scf.if %9 {
      %c0_48 = arith.constant 0 : index
      %c0_49 = arith.constant 0 : index
      %c0_50 = arith.constant 0 : index
      %59 = vector.load %arg2[%c0_48, %c0_49, %c0_50] : memref<8x16x4xf32, #tpu.memory_space<vmem>>, vector<1x16x4xf32>
      %60 = vector.shape_cast %59 : vector<1x16x4xf32> to vector<16x4xf32>
      %c0_51 = arith.constant 0 : index
      %c0_52 = arith.constant 0 : index
      %c0_53 = arith.constant 0 : index
      %61 = vector.load %arg3[%c0_51, %c0_52, %c0_53] : memref<8x16x4xf32, #tpu.memory_space<vmem>>, vector<1x16x4xf32>
      %62 = vector.shape_cast %61 : vector<1x16x4xf32> to vector<16x4xf32>
      %c0_54 = arith.constant 0 : index
      %c0_55 = arith.constant 0 : index
      %c0_56 = arith.constant 0 : index
      %63 = vector.load %arg4[%c0_54, %c0_55, %c0_56] : memref<8x4x16xf32, #tpu.memory_space<vmem>>, vector<1x4x16xf32>
      %64 = vector.shape_cast %63 : vector<1x4x16xf32> to vector<4x16xf32>
      %c0_57 = arith.constant 0 : index
      %c0_58 = arith.constant 0 : index
      %c0_59 = arith.constant 0 : index
      %65 = vector.load %arg5[%c0_57, %c0_58, %c0_59] : memref<8x4x16xf32, #tpu.memory_space<vmem>>, vector<1x4x16xf32>
      %66 = vector.shape_cast %65 : vector<1x4x16xf32> to vector<4x16xf32>
      %c0_60 = arith.constant 0 : index
      %c0_61 = arith.constant 0 : index
      %c0_62 = arith.constant 0 : index
      %67 = vector.load %arg6[%c0_60, %c0_61, %c0_62] : memref<8x1x4xf32, #tpu.memory_space<vmem>>, vector<1x1x4xf32>
      %68 = vector.shape_cast %67 : vector<1x1x4xf32> to vector<1x4xf32>
      %cst = arith.constant dense<0.000000e+00> : vector<8x4xf32>
      %69 = tpu.matmul %5, %60, %cst {dimension_numbers = #tpu.dot_dimension_numbers<[1], [0], [0], [1], [0, 0, 1, 1], [], []>} : vector<8x16xf32>, vector<16x4xf32>, vector<8x4xf32> -> vector<8x4xf32>
      %70 = arith.mulf %5, %5 : vector<8x16xf32>
      %cst_63 = arith.constant dense<0.000000e+00> : vector<8x4xf32>
      %71 = tpu.matmul %70, %62, %cst_63 {dimension_numbers = #tpu.dot_dimension_numbers<[1], [0], [0], [1], [0, 0, 1, 1], [], []>} : vector<8x16xf32>, vector<16x4xf32>, vector<8x4xf32> -> vector<8x4xf32>
      %cst_64 = arith.constant 5.000000e-01 : f32
      %72 = vector.broadcast %cst_64 : f32 to vector<8x4xf32>
      %73 = arith.mulf %72, %71 : vector<8x4xf32>
      %74 = arith.subf %69, %73 : vector<8x4xf32>
      %75 = vector.broadcast %68 : vector<1x4xf32> to vector<8x4xf32>
      %76 = arith.addf %74, %75 : vector<8x4xf32>
      %cst_65 = arith.constant dense<0xFF800000> : vector<8xf32>
      %77 = vector.multi_reduction <maximumf>, %76, %cst_65 [1] : vector<8x4xf32> to vector<8xf32>
      %78 = vector.shape_cast %77 : vector<8xf32> to vector<8x1xf32>
      %79 = vector.broadcast %78 : vector<8x1xf32> to vector<8x4xf32>
      %80 = arith.subf %76, %79 : vector<8x4xf32>
      %81 = math.exp %80 : vector<8x4xf32>
      %cst_66 = arith.constant dense<0.000000e+00> : vector<8xf32>
      %82 = vector.multi_reduction <add>, %81, %cst_66 [1] : vector<8x4xf32> to vector<8xf32>
      %83 = vector.shape_cast %82 : vector<8xf32> to vector<8x1xf32>
      %84 = tpu.reciprocal %83 {approx = true} : vector<8x1xf32> -> vector<8x1xf32>
      %85 = arith.mulf %83, %84 : vector<8x1xf32>
      %cst_67 = arith.constant 2.000000e+00 : f32
      %86 = vector.broadcast %cst_67 : f32 to vector<8x1xf32>
      %87 = arith.subf %86, %85 : vector<8x1xf32>
      %88 = arith.mulf %84, %87 : vector<8x1xf32>
      %89 = vector.broadcast %88 : vector<8x1xf32> to vector<8x4xf32>
      %90 = arith.mulf %81, %89 : vector<8x4xf32>
      %cst_68 = arith.constant dense<0.000000e+00> : vector<8x16xf32>
      %91 = tpu.matmul %90, %64, %cst_68 {dimension_numbers = #tpu.dot_dimension_numbers<[1], [0], [0], [1], [0, 0, 1, 1], [], []>} : vector<8x4xf32>, vector<4x16xf32>, vector<8x16xf32> -> vector<8x16xf32>
      %cst_69 = arith.constant dense<0.000000e+00> : vector<8x16xf32>
      %92 = tpu.matmul %90, %66, %cst_69 {dimension_numbers = #tpu.dot_dimension_numbers<[1], [0], [0], [1], [0, 0, 1, 1], [], []>} : vector<8x4xf32>, vector<4x16xf32>, vector<8x16xf32> -> vector<8x16xf32>
      %93 = arith.mulf %5, %92 : vector<8x16xf32>
      %94 = arith.subf %91, %93 : vector<8x16xf32>
      %c0_70 = arith.constant 0 : index
      %c0_71 = arith.constant 0 : index
      %95 = vector.load %arg8[%c0_70, %c0_71] : memref<8x128xf32, #tpu.memory_space<vmem>>, vector<8x16xf32>
      %cst_72 = arith.constant 0.00526315812 : f32
      %96 = vector.broadcast %cst_72 : f32 to vector<8x16xf32>
      %97 = arith.mulf %96, %94 : vector<8x16xf32>
      %98 = arith.addf %5, %97 : vector<8x16xf32>
      %cst_73 = arith.constant 0.072547622 : f32
      %99 = vector.broadcast %cst_73 : f32 to vector<8x16xf32>
      %100 = arith.mulf %99, %95 : vector<8x16xf32>
      %101 = arith.addf %98, %100 : vector<8x16xf32>
      %c0_74 = arith.constant 0 : index
      %c0_75 = arith.constant 0 : index
      %102 = vector.load %arg10[%c0_74, %c0_75] : memref<8x16xf32, #tpu.memory_space<vmem>>, vector<8x16xf32>
      tpu.vector_store %arg10[%c0_74, %c0_75], %101 {strides = array<i32>} : memref<8x16xf32, #tpu.memory_space<vmem>>, vector<8x16xf32>,
    } else {
    }
    %c8_i32_6 = arith.constant 8 : i32
    %10 = arith.muli %arg1, %c8_i32_6 : i32
    %c1_i32 = arith.constant 1 : i32
    %11 = arith.addi %10, %c1_i32 : i32
    %c0_7 = arith.constant 0 : index
    %c0_8 = arith.constant 0 : index
    %12 = vector.load %arg10[%c0_7, %c0_8] : memref<8x16xf32, #tpu.memory_space<vmem>>, vector<8x16xf32>
    %c0_9 = arith.constant 0 : index
    %c16 = arith.constant 16 : index
    %13 = vector.load %arg9[%c0_9, %c16] : memref<8x128xf32, #tpu.memory_space<vmem>>, vector<8x16xf32>
    tpu.vector_store %arg9[%c0_9, %c16], %12 {strides = array<i32>} : memref<8x128xf32, #tpu.memory_space<vmem>>, vector<8x16xf32>,
    %c19_i32_10 = arith.constant 19 : i32
    %14 = arith.cmpi slt, %11, %c19_i32_10 : i32
    %15 = arith.extui %14 : i1 to i32
    %c0_i32_11 = arith.constant 0 : i32
    %16 = arith.cmpi ne, %15, %c0_i32_11 : i32
    scf.if %16 {
      %c1 = arith.constant 1 : index
      %c0_48 = arith.constant 0 : index
      %c0_49 = arith.constant 0 : index
      %59 = vector.load %arg2[%c1, %c0_48, %c0_49] : memref<8x16x4xf32, #tpu.memory_space<vmem>>, vector<1x16x4xf32>
      %60 = vector.shape_cast %59 : vector<1x16x4xf32> to vector<16x4xf32>
      %c1_50 = arith.constant 1 : index
      %c0_51 = arith.constant 0 : index
      %c0_52 = arith.constant 0 : index
      %61 = vector.load %arg3[%c1_50, %c0_51, %c0_52] : memref<8x16x4xf32, #tpu.memory_space<vmem>>, vector<1x16x4xf32>
      %62 = vector.shape_cast %61 : vector<1x16x4xf32> to vector<16x4xf32>
      %c1_53 = arith.constant 1 : index
      %c0_54 = arith.constant 0 : index
      %c0_55 = arith.constant 0 : index
      %63 = vector.load %arg4[%c1_53, %c0_54, %c0_55] : memref<8x4x16xf32, #tpu.memory_space<vmem>>, vector<1x4x16xf32>
      %64 = vector.shape_cast %63 : vector<1x4x16xf32> to vector<4x16xf32>
      %c1_56 = arith.constant 1 : index
      %c0_57 = arith.constant 0 : index
      %c0_58 = arith.constant 0 : index
      %65 = vector.load %arg5[%c1_56, %c0_57, %c0_58] : memref<8x4x16xf32, #tpu.memory_space<vmem>>, vector<1x4x16xf32>
      %66 = vector.shape_cast %65 : vector<1x4x16xf32> to vector<4x16xf32>
      %c1_59 = arith.constant 1 : index
      %c0_60 = arith.constant 0 : index
      %c0_61 = arith.constant 0 : index
      %67 = vector.load %arg6[%c1_59, %c0_60, %c0_61] : memref<8x1x4xf32, #tpu.memory_space<vmem>>, vector<1x1x4xf32>
      %68 = vector.shape_cast %67 : vector<1x1x4xf32> to vector<1x4xf32>
      %cst = arith.constant dense<0.000000e+00> : vector<8x4xf32>
      %69 = tpu.matmul %12, %60, %cst {dimension_numbers = #tpu.dot_dimension_numbers<[1], [0], [0], [1], [0, 0, 1, 1], [], []>} : vector<8x16xf32>, vector<16x4xf32>, vector<8x4xf32> -> vector<8x4xf32>
      %70 = arith.mulf %12, %12 : vector<8x16xf32>
      %cst_62 = arith.constant dense<0.000000e+00> : vector<8x4xf32>
      %71 = tpu.matmul %70, %62, %cst_62 {dimension_numbers = #tpu.dot_dimension_numbers<[1], [0], [0], [1], [0, 0, 1, 1], [], []>} : vector<8x16xf32>, vector<16x4xf32>, vector<8x4xf32> -> vector<8x4xf32>
      %cst_63 = arith.constant 5.000000e-01 : f32
      %72 = vector.broadcast %cst_63 : f32 to vector<8x4xf32>
      %73 = arith.mulf %72, %71 : vector<8x4xf32>
      %74 = arith.subf %69, %73 : vector<8x4xf32>
      %75 = vector.broadcast %68 : vector<1x4xf32> to vector<8x4xf32>
      %76 = arith.addf %74, %75 : vector<8x4xf32>
      %cst_64 = arith.constant dense<0xFF800000> : vector<8xf32>
      %77 = vector.multi_reduction <maximumf>, %76, %cst_64 [1] : vector<8x4xf32> to vector<8xf32>
      %78 = vector.shape_cast %77 : vector<8xf32> to vector<8x1xf32>
      %79 = vector.broadcast %78 : vector<8x1xf32> to vector<8x4xf32>
      %80 = arith.subf %76, %79 : vector<8x4xf32>
      %81 = math.exp %80 : vector<8x4xf32>
      %cst_65 = arith.constant dense<0.000000e+00> : vector<8xf32>
      %82 = vector.multi_reduction <add>, %81, %cst_65 [1] : vector<8x4xf32> to vector<8xf32>
      %83 = vector.shape_cast %82 : vector<8xf32> to vector<8x1xf32>
      %84 = tpu.reciprocal %83 {approx = true} : vector<8x1xf32> -> vector<8x1xf32>
      %85 = arith.mulf %83, %84 : vector<8x1xf32>
      %cst_66 = arith.constant 2.000000e+00 : f32
      %86 = vector.broadcast %cst_66 : f32 to vector<8x1xf32>
      %87 = arith.subf %86, %85 : vector<8x1xf32>
      %88 = arith.mulf %84, %87 : vector<8x1xf32>
      %89 = vector.broadcast %88 : vector<8x1xf32> to vector<8x4xf32>
      %90 = arith.mulf %81, %89 : vector<8x4xf32>
      %cst_67 = arith.constant dense<0.000000e+00> : vector<8x16xf32>
      %91 = tpu.matmul %90, %64, %cst_67 {dimension_numbers = #tpu.dot_dimension_numbers<[1], [0], [0], [1], [0, 0, 1, 1], [], []>} : vector<8x4xf32>, vector<4x16xf32>, vector<8x16xf32> -> vector<8x16xf32>
      %cst_68 = arith.constant dense<0.000000e+00> : vector<8x16xf32>
      %92 = tpu.matmul %90, %66, %cst_68 {dimension_numbers = #tpu.dot_dimension_numbers<[1], [0], [0], [1], [0, 0, 1, 1], [], []>} : vector<8x4xf32>, vector<4x16xf32>, vector<8x16xf32> -> vector<8x16xf32>
      %93 = arith.mulf %12, %92 : vector<8x16xf32>
      %94 = arith.subf %91, %93 : vector<8x16xf32>
      %c0_69 = arith.constant 0 : index
      %c16_70 = arith.constant 16 : index
      %95 = vector.load %arg8[%c0_69, %c16_70] : memref<8x128xf32, #tpu.memory_space<vmem>>, vector<8x16xf32>
      %cst_71 = arith.constant 0.00526315812 : f32
      %96 = vector.broadcast %cst_71 : f32 to vector<8x16xf32>
      %97 = arith.mulf %96, %94 : vector<8x16xf32>
      %98 = arith.addf %12, %97 : vector<8x16xf32>
      %cst_72 = arith.constant 0.072547622 : f32
      %99 = vector.broadcast %cst_72 : f32 to vector<8x16xf32>
      %100 = arith.mulf %99, %95 : vector<8x16xf32>
      %101 = arith.addf %98, %100 : vector<8x16xf32>
      %c0_73 = arith.constant 0 : index
      %c0_74 = arith.constant 0 : index
      %102 = vector.load %arg10[%c0_73, %c0_74] : memref<8x16xf32, #tpu.memory_space<vmem>>, vector<8x16xf32>
      tpu.vector_store %arg10[%c0_73, %c0_74], %101 {strides = array<i32>} : memref<8x16xf32, #tpu.memory_space<vmem>>, vector<8x16xf32>,
    } else {
    }
    %c8_i32_12 = arith.constant 8 : i32
    %17 = arith.muli %arg1, %c8_i32_12 : i32
    %c2_i32 = arith.constant 2 : i32
    %18 = arith.addi %17, %c2_i32 : i32
    %c0_13 = arith.constant 0 : index
    %c0_14 = arith.constant 0 : index
    %19 = vector.load %arg10[%c0_13, %c0_14] : memref<8x16xf32, #tpu.memory_space<vmem>>, vector<8x16xf32>
    %c0_15 = arith.constant 0 : index
    %c32 = arith.constant 32 : index
    %20 = vector.load %arg9[%c0_15, %c32] : memref<8x128xf32, #tpu.memory_space<vmem>>, vector<8x16xf32>
    tpu.vector_store %arg9[%c0_15, %c32], %19 {strides = array<i32>} : memref<8x128xf32, #tpu.memory_space<vmem>>, vector<8x16xf32>,
    %c19_i32_16 = arith.constant 19 : i32
    %21 = arith.cmpi slt, %18, %c19_i32_16 : i32
    %22 = arith.extui %21 : i1 to i32
    %c0_i32_17 = arith.constant 0 : i32
    %23 = arith.cmpi ne, %22, %c0_i32_17 : i32
    scf.if %23 {
      %c2 = arith.constant 2 : index
      %c0_48 = arith.constant 0 : index
      %c0_49 = arith.constant 0 : index
      %59 = vector.load %arg2[%c2, %c0_48, %c0_49] : memref<8x16x4xf32, #tpu.memory_space<vmem>>, vector<1x16x4xf32>
      %60 = vector.shape_cast %59 : vector<1x16x4xf32> to vector<16x4xf32>
      %c2_50 = arith.constant 2 : index
      %c0_51 = arith.constant 0 : index
      %c0_52 = arith.constant 0 : index
      %61 = vector.load %arg3[%c2_50, %c0_51, %c0_52] : memref<8x16x4xf32, #tpu.memory_space<vmem>>, vector<1x16x4xf32>
      %62 = vector.shape_cast %61 : vector<1x16x4xf32> to vector<16x4xf32>
      %c2_53 = arith.constant 2 : index
      %c0_54 = arith.constant 0 : index
      %c0_55 = arith.constant 0 : index
      %63 = vector.load %arg4[%c2_53, %c0_54, %c0_55] : memref<8x4x16xf32, #tpu.memory_space<vmem>>, vector<1x4x16xf32>
      %64 = vector.shape_cast %63 : vector<1x4x16xf32> to vector<4x16xf32>
      %c2_56 = arith.constant 2 : index
      %c0_57 = arith.constant 0 : index
      %c0_58 = arith.constant 0 : index
      %65 = vector.load %arg5[%c2_56, %c0_57, %c0_58] : memref<8x4x16xf32, #tpu.memory_space<vmem>>, vector<1x4x16xf32>
      %66 = vector.shape_cast %65 : vector<1x4x16xf32> to vector<4x16xf32>
      %c2_59 = arith.constant 2 : index
      %c0_60 = arith.constant 0 : index
      %c0_61 = arith.constant 0 : index
      %67 = vector.load %arg6[%c2_59, %c0_60, %c0_61] : memref<8x1x4xf32, #tpu.memory_space<vmem>>, vector<1x1x4xf32>
      %68 = vector.shape_cast %67 : vector<1x1x4xf32> to vector<1x4xf32>
      %cst = arith.constant dense<0.000000e+00> : vector<8x4xf32>
      %69 = tpu.matmul %19, %60, %cst {dimension_numbers = #tpu.dot_dimension_numbers<[1], [0], [0], [1], [0, 0, 1, 1], [], []>} : vector<8x16xf32>, vector<16x4xf32>, vector<8x4xf32> -> vector<8x4xf32>
      %70 = arith.mulf %19, %19 : vector<8x16xf32>
      %cst_62 = arith.constant dense<0.000000e+00> : vector<8x4xf32>
      %71 = tpu.matmul %70, %62, %cst_62 {dimension_numbers = #tpu.dot_dimension_numbers<[1], [0], [0], [1], [0, 0, 1, 1], [], []>} : vector<8x16xf32>, vector<16x4xf32>, vector<8x4xf32> -> vector<8x4xf32>
      %cst_63 = arith.constant 5.000000e-01 : f32
      %72 = vector.broadcast %cst_63 : f32 to vector<8x4xf32>
      %73 = arith.mulf %72, %71 : vector<8x4xf32>
      %74 = arith.subf %69, %73 : vector<8x4xf32>
      %75 = vector.broadcast %68 : vector<1x4xf32> to vector<8x4xf32>
      %76 = arith.addf %74, %75 : vector<8x4xf32>
      %cst_64 = arith.constant dense<0xFF800000> : vector<8xf32>
      %77 = vector.multi_reduction <maximumf>, %76, %cst_64 [1] : vector<8x4xf32> to vector<8xf32>
      %78 = vector.shape_cast %77 : vector<8xf32> to vector<8x1xf32>
      %79 = vector.broadcast %78 : vector<8x1xf32> to vector<8x4xf32>
      %80 = arith.subf %76, %79 : vector<8x4xf32>
      %81 = math.exp %80 : vector<8x4xf32>
      %cst_65 = arith.constant dense<0.000000e+00> : vector<8xf32>
      %82 = vector.multi_reduction <add>, %81, %cst_65 [1] : vector<8x4xf32> to vector<8xf32>
      %83 = vector.shape_cast %82 : vector<8xf32> to vector<8x1xf32>
      %84 = tpu.reciprocal %83 {approx = true} : vector<8x1xf32> -> vector<8x1xf32>
      %85 = arith.mulf %83, %84 : vector<8x1xf32>
      %cst_66 = arith.constant 2.000000e+00 : f32
      %86 = vector.broadcast %cst_66 : f32 to vector<8x1xf32>
      %87 = arith.subf %86, %85 : vector<8x1xf32>
      %88 = arith.mulf %84, %87 : vector<8x1xf32>
      %89 = vector.broadcast %88 : vector<8x1xf32> to vector<8x4xf32>
      %90 = arith.mulf %81, %89 : vector<8x4xf32>
      %cst_67 = arith.constant dense<0.000000e+00> : vector<8x16xf32>
      %91 = tpu.matmul %90, %64, %cst_67 {dimension_numbers = #tpu.dot_dimension_numbers<[1], [0], [0], [1], [0, 0, 1, 1], [], []>} : vector<8x4xf32>, vector<4x16xf32>, vector<8x16xf32> -> vector<8x16xf32>
      %cst_68 = arith.constant dense<0.000000e+00> : vector<8x16xf32>
      %92 = tpu.matmul %90, %66, %cst_68 {dimension_numbers = #tpu.dot_dimension_numbers<[1], [0], [0], [1], [0, 0, 1, 1], [], []>} : vector<8x4xf32>, vector<4x16xf32>, vector<8x16xf32> -> vector<8x16xf32>
      %93 = arith.mulf %19, %92 : vector<8x16xf32>
      %94 = arith.subf %91, %93 : vector<8x16xf32>
      %c0_69 = arith.constant 0 : index
      %c32_70 = arith.constant 32 : index
      %95 = vector.load %arg8[%c0_69, %c32_70] : memref<8x128xf32, #tpu.memory_space<vmem>>, vector<8x16xf32>
      %cst_71 = arith.constant 0.00526315812 : f32
      %96 = vector.broadcast %cst_71 : f32 to vector<8x16xf32>
      %97 = arith.mulf %96, %94 : vector<8x16xf32>
      %98 = arith.addf %19, %97 : vector<8x16xf32>
      %cst_72 = arith.constant 0.072547622 : f32
      %99 = vector.broadcast %cst_72 : f32 to vector<8x16xf32>
      %100 = arith.mulf %99, %95 : vector<8x16xf32>
      %101 = arith.addf %98, %100 : vector<8x16xf32>
      %c0_73 = arith.constant 0 : index
      %c0_74 = arith.constant 0 : index
      %102 = vector.load %arg10[%c0_73, %c0_74] : memref<8x16xf32, #tpu.memory_space<vmem>>, vector<8x16xf32>
      tpu.vector_store %arg10[%c0_73, %c0_74], %101 {strides = array<i32>} : memref<8x16xf32, #tpu.memory_space<vmem>>, vector<8x16xf32>,
    } else {
    }
    %c8_i32_18 = arith.constant 8 : i32
    %24 = arith.muli %arg1, %c8_i32_18 : i32
    %c3_i32 = arith.constant 3 : i32
    %25 = arith.addi %24, %c3_i32 : i32
    %c0_19 = arith.constant 0 : index
    %c0_20 = arith.constant 0 : index
    %26 = vector.load %arg10[%c0_19, %c0_20] : memref<8x16xf32, #tpu.memory_space<vmem>>, vector<8x16xf32>
    %c0_21 = arith.constant 0 : index
    %c48 = arith.constant 48 : index
    %27 = vector.load %arg9[%c0_21, %c48] : memref<8x128xf32, #tpu.memory_space<vmem>>, vector<8x16xf32>
    tpu.vector_store %arg9[%c0_21, %c48], %26 {strides = array<i32>} : memref<8x128xf32, #tpu.memory_space<vmem>>, vector<8x16xf32>,
    %c19_i32_22 = arith.constant 19 : i32
    %28 = arith.cmpi slt, %25, %c19_i32_22 : i32
    %29 = arith.extui %28 : i1 to i32
    %c0_i32_23 = arith.constant 0 : i32
    %30 = arith.cmpi ne, %29, %c0_i32_23 : i32
    scf.if %30 {
      %c3 = arith.constant 3 : index
      %c0_48 = arith.constant 0 : index
      %c0_49 = arith.constant 0 : index
      %59 = vector.load %arg2[%c3, %c0_48, %c0_49] : memref<8x16x4xf32, #tpu.memory_space<vmem>>, vector<1x16x4xf32>
      %60 = vector.shape_cast %59 : vector<1x16x4xf32> to vector<16x4xf32>
      %c3_50 = arith.constant 3 : index
      %c0_51 = arith.constant 0 : index
      %c0_52 = arith.constant 0 : index
      %61 = vector.load %arg3[%c3_50, %c0_51, %c0_52] : memref<8x16x4xf32, #tpu.memory_space<vmem>>, vector<1x16x4xf32>
      %62 = vector.shape_cast %61 : vector<1x16x4xf32> to vector<16x4xf32>
      %c3_53 = arith.constant 3 : index
      %c0_54 = arith.constant 0 : index
      %c0_55 = arith.constant 0 : index
      %63 = vector.load %arg4[%c3_53, %c0_54, %c0_55] : memref<8x4x16xf32, #tpu.memory_space<vmem>>, vector<1x4x16xf32>
      %64 = vector.shape_cast %63 : vector<1x4x16xf32> to vector<4x16xf32>
      %c3_56 = arith.constant 3 : index
      %c0_57 = arith.constant 0 : index
      %c0_58 = arith.constant 0 : index
      %65 = vector.load %arg5[%c3_56, %c0_57, %c0_58] : memref<8x4x16xf32, #tpu.memory_space<vmem>>, vector<1x4x16xf32>
      %66 = vector.shape_cast %65 : vector<1x4x16xf32> to vector<4x16xf32>
      %c3_59 = arith.constant 3 : index
      %c0_60 = arith.constant 0 : index
      %c0_61 = arith.constant 0 : index
      %67 = vector.load %arg6[%c3_59, %c0_60, %c0_61] : memref<8x1x4xf32, #tpu.memory_space<vmem>>, vector<1x1x4xf32>
      %68 = vector.shape_cast %67 : vector<1x1x4xf32> to vector<1x4xf32>
      %cst = arith.constant dense<0.000000e+00> : vector<8x4xf32>
      %69 = tpu.matmul %26, %60, %cst {dimension_numbers = #tpu.dot_dimension_numbers<[1], [0], [0], [1], [0, 0, 1, 1], [], []>} : vector<8x16xf32>, vector<16x4xf32>, vector<8x4xf32> -> vector<8x4xf32>
      %70 = arith.mulf %26, %26 : vector<8x16xf32>
      %cst_62 = arith.constant dense<0.000000e+00> : vector<8x4xf32>
      %71 = tpu.matmul %70, %62, %cst_62 {dimension_numbers = #tpu.dot_dimension_numbers<[1], [0], [0], [1], [0, 0, 1, 1], [], []>} : vector<8x16xf32>, vector<16x4xf32>, vector<8x4xf32> -> vector<8x4xf32>
      %cst_63 = arith.constant 5.000000e-01 : f32
      %72 = vector.broadcast %cst_63 : f32 to vector<8x4xf32>
      %73 = arith.mulf %72, %71 : vector<8x4xf32>
      %74 = arith.subf %69, %73 : vector<8x4xf32>
      %75 = vector.broadcast %68 : vector<1x4xf32> to vector<8x4xf32>
      %76 = arith.addf %74, %75 : vector<8x4xf32>
      %cst_64 = arith.constant dense<0xFF800000> : vector<8xf32>
      %77 = vector.multi_reduction <maximumf>, %76, %cst_64 [1] : vector<8x4xf32> to vector<8xf32>
      %78 = vector.shape_cast %77 : vector<8xf32> to vector<8x1xf32>
      %79 = vector.broadcast %78 : vector<8x1xf32> to vector<8x4xf32>
      %80 = arith.subf %76, %79 : vector<8x4xf32>
      %81 = math.exp %80 : vector<8x4xf32>
      %cst_65 = arith.constant dense<0.000000e+00> : vector<8xf32>
      %82 = vector.multi_reduction <add>, %81, %cst_65 [1] : vector<8x4xf32> to vector<8xf32>
      %83 = vector.shape_cast %82 : vector<8xf32> to vector<8x1xf32>
      %84 = tpu.reciprocal %83 {approx = true} : vector<8x1xf32> -> vector<8x1xf32>
      %85 = arith.mulf %83, %84 : vector<8x1xf32>
      %cst_66 = arith.constant 2.000000e+00 : f32
      %86 = vector.broadcast %cst_66 : f32 to vector<8x1xf32>
      %87 = arith.subf %86, %85 : vector<8x1xf32>
      %88 = arith.mulf %84, %87 : vector<8x1xf32>
      %89 = vector.broadcast %88 : vector<8x1xf32> to vector<8x4xf32>
      %90 = arith.mulf %81, %89 : vector<8x4xf32>
      %cst_67 = arith.constant dense<0.000000e+00> : vector<8x16xf32>
      %91 = tpu.matmul %90, %64, %cst_67 {dimension_numbers = #tpu.dot_dimension_numbers<[1], [0], [0], [1], [0, 0, 1, 1], [], []>} : vector<8x4xf32>, vector<4x16xf32>, vector<8x16xf32> -> vector<8x16xf32>
      %cst_68 = arith.constant dense<0.000000e+00> : vector<8x16xf32>
      %92 = tpu.matmul %90, %66, %cst_68 {dimension_numbers = #tpu.dot_dimension_numbers<[1], [0], [0], [1], [0, 0, 1, 1], [], []>} : vector<8x4xf32>, vector<4x16xf32>, vector<8x16xf32> -> vector<8x16xf32>
      %93 = arith.mulf %26, %92 : vector<8x16xf32>
      %94 = arith.subf %91, %93 : vector<8x16xf32>
      %c0_69 = arith.constant 0 : index
      %c48_70 = arith.constant 48 : index
      %95 = vector.load %arg8[%c0_69, %c48_70] : memref<8x128xf32, #tpu.memory_space<vmem>>, vector<8x16xf32>
      %cst_71 = arith.constant 0.00526315812 : f32
      %96 = vector.broadcast %cst_71 : f32 to vector<8x16xf32>
      %97 = arith.mulf %96, %94 : vector<8x16xf32>
      %98 = arith.addf %26, %97 : vector<8x16xf32>
      %cst_72 = arith.constant 0.072547622 : f32
      %99 = vector.broadcast %cst_72 : f32 to vector<8x16xf32>
      %100 = arith.mulf %99, %95 : vector<8x16xf32>
      %101 = arith.addf %98, %100 : vector<8x16xf32>
      %c0_73 = arith.constant 0 : index
      %c0_74 = arith.constant 0 : index
      %102 = vector.load %arg10[%c0_73, %c0_74] : memref<8x16xf32, #tpu.memory_space<vmem>>, vector<8x16xf32>
      tpu.vector_store %arg10[%c0_73, %c0_74], %101 {strides = array<i32>} : memref<8x16xf32, #tpu.memory_space<vmem>>, vector<8x16xf32>,
    } else {
    }
    %c8_i32_24 = arith.constant 8 : i32
    %31 = arith.muli %arg1, %c8_i32_24 : i32
    %c4_i32 = arith.constant 4 : i32
    %32 = arith.addi %31, %c4_i32 : i32
    %c0_25 = arith.constant 0 : index
    %c0_26 = arith.constant 0 : index
    %33 = vector.load %arg10[%c0_25, %c0_26] : memref<8x16xf32, #tpu.memory_space<vmem>>, vector<8x16xf32>
    %c0_27 = arith.constant 0 : index
    %c64 = arith.constant 64 : index
    %34 = vector.load %arg9[%c0_27, %c64] : memref<8x128xf32, #tpu.memory_space<vmem>>, vector<8x16xf32>
    tpu.vector_store %arg9[%c0_27, %c64], %33 {strides = array<i32>} : memref<8x128xf32, #tpu.memory_space<vmem>>, vector<8x16xf32>,
    %c19_i32_28 = arith.constant 19 : i32
    %35 = arith.cmpi slt, %32, %c19_i32_28 : i32
    %36 = arith.extui %35 : i1 to i32
    %c0_i32_29 = arith.constant 0 : i32
    %37 = arith.cmpi ne, %36, %c0_i32_29 : i32
    scf.if %37 {
      %c4 = arith.constant 4 : index
      %c0_48 = arith.constant 0 : index
      %c0_49 = arith.constant 0 : index
      %59 = vector.load %arg2[%c4, %c0_48, %c0_49] : memref<8x16x4xf32, #tpu.memory_space<vmem>>, vector<1x16x4xf32>
      %60 = vector.shape_cast %59 : vector<1x16x4xf32> to vector<16x4xf32>
      %c4_50 = arith.constant 4 : index
      %c0_51 = arith.constant 0 : index
      %c0_52 = arith.constant 0 : index
      %61 = vector.load %arg3[%c4_50, %c0_51, %c0_52] : memref<8x16x4xf32, #tpu.memory_space<vmem>>, vector<1x16x4xf32>
      %62 = vector.shape_cast %61 : vector<1x16x4xf32> to vector<16x4xf32>
      %c4_53 = arith.constant 4 : index
      %c0_54 = arith.constant 0 : index
      %c0_55 = arith.constant 0 : index
      %63 = vector.load %arg4[%c4_53, %c0_54, %c0_55] : memref<8x4x16xf32, #tpu.memory_space<vmem>>, vector<1x4x16xf32>
      %64 = vector.shape_cast %63 : vector<1x4x16xf32> to vector<4x16xf32>
      %c4_56 = arith.constant 4 : index
      %c0_57 = arith.constant 0 : index
      %c0_58 = arith.constant 0 : index
      %65 = vector.load %arg5[%c4_56, %c0_57, %c0_58] : memref<8x4x16xf32, #tpu.memory_space<vmem>>, vector<1x4x16xf32>
      %66 = vector.shape_cast %65 : vector<1x4x16xf32> to vector<4x16xf32>
      %c4_59 = arith.constant 4 : index
      %c0_60 = arith.constant 0 : index
      %c0_61 = arith.constant 0 : index
      %67 = vector.load %arg6[%c4_59, %c0_60, %c0_61] : memref<8x1x4xf32, #tpu.memory_space<vmem>>, vector<1x1x4xf32>
      %68 = vector.shape_cast %67 : vector<1x1x4xf32> to vector<1x4xf32>
      %cst = arith.constant dense<0.000000e+00> : vector<8x4xf32>
      %69 = tpu.matmul %33, %60, %cst {dimension_numbers = #tpu.dot_dimension_numbers<[1], [0], [0], [1], [0, 0, 1, 1], [], []>} : vector<8x16xf32>, vector<16x4xf32>, vector<8x4xf32> -> vector<8x4xf32>
      %70 = arith.mulf %33, %33 : vector<8x16xf32>
      %cst_62 = arith.constant dense<0.000000e+00> : vector<8x4xf32>
      %71 = tpu.matmul %70, %62, %cst_62 {dimension_numbers = #tpu.dot_dimension_numbers<[1], [0], [0], [1], [0, 0, 1, 1], [], []>} : vector<8x16xf32>, vector<16x4xf32>, vector<8x4xf32> -> vector<8x4xf32>
      %cst_63 = arith.constant 5.000000e-01 : f32
      %72 = vector.broadcast %cst_63 : f32 to vector<8x4xf32>
      %73 = arith.mulf %72, %71 : vector<8x4xf32>
      %74 = arith.subf %69, %73 : vector<8x4xf32>
      %75 = vector.broadcast %68 : vector<1x4xf32> to vector<8x4xf32>
      %76 = arith.addf %74, %75 : vector<8x4xf32>
      %cst_64 = arith.constant dense<0xFF800000> : vector<8xf32>
      %77 = vector.multi_reduction <maximumf>, %76, %cst_64 [1] : vector<8x4xf32> to vector<8xf32>
      %78 = vector.shape_cast %77 : vector<8xf32> to vector<8x1xf32>
      %79 = vector.broadcast %78 : vector<8x1xf32> to vector<8x4xf32>
      %80 = arith.subf %76, %79 : vector<8x4xf32>
      %81 = math.exp %80 : vector<8x4xf32>
      %cst_65 = arith.constant dense<0.000000e+00> : vector<8xf32>
      %82 = vector.multi_reduction <add>, %81, %cst_65 [1] : vector<8x4xf32> to vector<8xf32>
      %83 = vector.shape_cast %82 : vector<8xf32> to vector<8x1xf32>
      %84 = tpu.reciprocal %83 {approx = true} : vector<8x1xf32> -> vector<8x1xf32>
      %85 = arith.mulf %83, %84 : vector<8x1xf32>
      %cst_66 = arith.constant 2.000000e+00 : f32
      %86 = vector.broadcast %cst_66 : f32 to vector<8x1xf32>
      %87 = arith.subf %86, %85 : vector<8x1xf32>
      %88 = arith.mulf %84, %87 : vector<8x1xf32>
      %89 = vector.broadcast %88 : vector<8x1xf32> to vector<8x4xf32>
      %90 = arith.mulf %81, %89 : vector<8x4xf32>
      %cst_67 = arith.constant dense<0.000000e+00> : vector<8x16xf32>
      %91 = tpu.matmul %90, %64, %cst_67 {dimension_numbers = #tpu.dot_dimension_numbers<[1], [0], [0], [1], [0, 0, 1, 1], [], []>} : vector<8x4xf32>, vector<4x16xf32>, vector<8x16xf32> -> vector<8x16xf32>
      %cst_68 = arith.constant dense<0.000000e+00> : vector<8x16xf32>
      %92 = tpu.matmul %90, %66, %cst_68 {dimension_numbers = #tpu.dot_dimension_numbers<[1], [0], [0], [1], [0, 0, 1, 1], [], []>} : vector<8x4xf32>, vector<4x16xf32>, vector<8x16xf32> -> vector<8x16xf32>
      %93 = arith.mulf %33, %92 : vector<8x16xf32>
      %94 = arith.subf %91, %93 : vector<8x16xf32>
      %c0_69 = arith.constant 0 : index
      %c64_70 = arith.constant 64 : index
      %95 = vector.load %arg8[%c0_69, %c64_70] : memref<8x128xf32, #tpu.memory_space<vmem>>, vector<8x16xf32>
      %cst_71 = arith.constant 0.00526315812 : f32
      %96 = vector.broadcast %cst_71 : f32 to vector<8x16xf32>
      %97 = arith.mulf %96, %94 : vector<8x16xf32>
      %98 = arith.addf %33, %97 : vector<8x16xf32>
      %cst_72 = arith.constant 0.072547622 : f32
      %99 = vector.broadcast %cst_72 : f32 to vector<8x16xf32>
      %100 = arith.mulf %99, %95 : vector<8x16xf32>
      %101 = arith.addf %98, %100 : vector<8x16xf32>
      %c0_73 = arith.constant 0 : index
      %c0_74 = arith.constant 0 : index
      %102 = vector.load %arg10[%c0_73, %c0_74] : memref<8x16xf32, #tpu.memory_space<vmem>>, vector<8x16xf32>
      tpu.vector_store %arg10[%c0_73, %c0_74], %101 {strides = array<i32>} : memref<8x16xf32, #tpu.memory_space<vmem>>, vector<8x16xf32>,
    } else {
    }
    %c8_i32_30 = arith.constant 8 : i32
    %38 = arith.muli %arg1, %c8_i32_30 : i32
    %c5_i32 = arith.constant 5 : i32
    %39 = arith.addi %38, %c5_i32 : i32
    %c0_31 = arith.constant 0 : index
    %c0_32 = arith.constant 0 : index
    %40 = vector.load %arg10[%c0_31, %c0_32] : memref<8x16xf32, #tpu.memory_space<vmem>>, vector<8x16xf32>
    %c0_33 = arith.constant 0 : index
    %c80 = arith.constant 80 : index
    %41 = vector.load %arg9[%c0_33, %c80] : memref<8x128xf32, #tpu.memory_space<vmem>>, vector<8x16xf32>
    tpu.vector_store %arg9[%c0_33, %c80], %40 {strides = array<i32>} : memref<8x128xf32, #tpu.memory_space<vmem>>, vector<8x16xf32>,
    %c19_i32_34 = arith.constant 19 : i32
    %42 = arith.cmpi slt, %39, %c19_i32_34 : i32
    %43 = arith.extui %42 : i1 to i32
    %c0_i32_35 = arith.constant 0 : i32
    %44 = arith.cmpi ne, %43, %c0_i32_35 : i32
    scf.if %44 {
      %c5 = arith.constant 5 : index
      %c0_48 = arith.constant 0 : index
      %c0_49 = arith.constant 0 : index
      %59 = vector.load %arg2[%c5, %c0_48, %c0_49] : memref<8x16x4xf32, #tpu.memory_space<vmem>>, vector<1x16x4xf32>
      %60 = vector.shape_cast %59 : vector<1x16x4xf32> to vector<16x4xf32>
      %c5_50 = arith.constant 5 : index
      %c0_51 = arith.constant 0 : index
      %c0_52 = arith.constant 0 : index
      %61 = vector.load %arg3[%c5_50, %c0_51, %c0_52] : memref<8x16x4xf32, #tpu.memory_space<vmem>>, vector<1x16x4xf32>
      %62 = vector.shape_cast %61 : vector<1x16x4xf32> to vector<16x4xf32>
      %c5_53 = arith.constant 5 : index
      %c0_54 = arith.constant 0 : index
      %c0_55 = arith.constant 0 : index
      %63 = vector.load %arg4[%c5_53, %c0_54, %c0_55] : memref<8x4x16xf32, #tpu.memory_space<vmem>>, vector<1x4x16xf32>
      %64 = vector.shape_cast %63 : vector<1x4x16xf32> to vector<4x16xf32>
      %c5_56 = arith.constant 5 : index
      %c0_57 = arith.constant 0 : index
      %c0_58 = arith.constant 0 : index
      %65 = vector.load %arg5[%c5_56, %c0_57, %c0_58] : memref<8x4x16xf32, #tpu.memory_space<vmem>>, vector<1x4x16xf32>
      %66 = vector.shape_cast %65 : vector<1x4x16xf32> to vector<4x16xf32>
      %c5_59 = arith.constant 5 : index
      %c0_60 = arith.constant 0 : index
      %c0_61 = arith.constant 0 : index
      %67 = vector.load %arg6[%c5_59, %c0_60, %c0_61] : memref<8x1x4xf32, #tpu.memory_space<vmem>>, vector<1x1x4xf32>
      %68 = vector.shape_cast %67 : vector<1x1x4xf32> to vector<1x4xf32>
      %cst = arith.constant dense<0.000000e+00> : vector<8x4xf32>
      %69 = tpu.matmul %40, %60, %cst {dimension_numbers = #tpu.dot_dimension_numbers<[1], [0], [0], [1], [0, 0, 1, 1], [], []>} : vector<8x16xf32>, vector<16x4xf32>, vector<8x4xf32> -> vector<8x4xf32>
      %70 = arith.mulf %40, %40 : vector<8x16xf32>
      %cst_62 = arith.constant dense<0.000000e+00> : vector<8x4xf32>
      %71 = tpu.matmul %70, %62, %cst_62 {dimension_numbers = #tpu.dot_dimension_numbers<[1], [0], [0], [1], [0, 0, 1, 1], [], []>} : vector<8x16xf32>, vector<16x4xf32>, vector<8x4xf32> -> vector<8x4xf32>
      %cst_63 = arith.constant 5.000000e-01 : f32
      %72 = vector.broadcast %cst_63 : f32 to vector<8x4xf32>
      %73 = arith.mulf %72, %71 : vector<8x4xf32>
      %74 = arith.subf %69, %73 : vector<8x4xf32>
      %75 = vector.broadcast %68 : vector<1x4xf32> to vector<8x4xf32>
      %76 = arith.addf %74, %75 : vector<8x4xf32>
      %cst_64 = arith.constant dense<0xFF800000> : vector<8xf32>
      %77 = vector.multi_reduction <maximumf>, %76, %cst_64 [1] : vector<8x4xf32> to vector<8xf32>
      %78 = vector.shape_cast %77 : vector<8xf32> to vector<8x1xf32>
      %79 = vector.broadcast %78 : vector<8x1xf32> to vector<8x4xf32>
      %80 = arith.subf %76, %79 : vector<8x4xf32>
      %81 = math.exp %80 : vector<8x4xf32>
      %cst_65 = arith.constant dense<0.000000e+00> : vector<8xf32>
      %82 = vector.multi_reduction <add>, %81, %cst_65 [1] : vector<8x4xf32> to vector<8xf32>
      %83 = vector.shape_cast %82 : vector<8xf32> to vector<8x1xf32>
      %84 = tpu.reciprocal %83 {approx = true} : vector<8x1xf32> -> vector<8x1xf32>
      %85 = arith.mulf %83, %84 : vector<8x1xf32>
      %cst_66 = arith.constant 2.000000e+00 : f32
      %86 = vector.broadcast %cst_66 : f32 to vector<8x1xf32>
      %87 = arith.subf %86, %85 : vector<8x1xf32>
      %88 = arith.mulf %84, %87 : vector<8x1xf32>
      %89 = vector.broadcast %88 : vector<8x1xf32> to vector<8x4xf32>
      %90 = arith.mulf %81, %89 : vector<8x4xf32>
      %cst_67 = arith.constant dense<0.000000e+00> : vector<8x16xf32>
      %91 = tpu.matmul %90, %64, %cst_67 {dimension_numbers = #tpu.dot_dimension_numbers<[1], [0], [0], [1], [0, 0, 1, 1], [], []>} : vector<8x4xf32>, vector<4x16xf32>, vector<8x16xf32> -> vector<8x16xf32>
      %cst_68 = arith.constant dense<0.000000e+00> : vector<8x16xf32>
      %92 = tpu.matmul %90, %66, %cst_68 {dimension_numbers = #tpu.dot_dimension_numbers<[1], [0], [0], [1], [0, 0, 1, 1], [], []>} : vector<8x4xf32>, vector<4x16xf32>, vector<8x16xf32> -> vector<8x16xf32>
      %93 = arith.mulf %40, %92 : vector<8x16xf32>
      %94 = arith.subf %91, %93 : vector<8x16xf32>
      %c0_69 = arith.constant 0 : index
      %c80_70 = arith.constant 80 : index
      %95 = vector.load %arg8[%c0_69, %c80_70] : memref<8x128xf32, #tpu.memory_space<vmem>>, vector<8x16xf32>
      %cst_71 = arith.constant 0.00526315812 : f32
      %96 = vector.broadcast %cst_71 : f32 to vector<8x16xf32>
      %97 = arith.mulf %96, %94 : vector<8x16xf32>
      %98 = arith.addf %40, %97 : vector<8x16xf32>
      %cst_72 = arith.constant 0.072547622 : f32
      %99 = vector.broadcast %cst_72 : f32 to vector<8x16xf32>
      %100 = arith.mulf %99, %95 : vector<8x16xf32>
      %101 = arith.addf %98, %100 : vector<8x16xf32>
      %c0_73 = arith.constant 0 : index
      %c0_74 = arith.constant 0 : index
      %102 = vector.load %arg10[%c0_73, %c0_74] : memref<8x16xf32, #tpu.memory_space<vmem>>, vector<8x16xf32>
      tpu.vector_store %arg10[%c0_73, %c0_74], %101 {strides = array<i32>} : memref<8x16xf32, #tpu.memory_space<vmem>>, vector<8x16xf32>,
    } else {
    }
    %c8_i32_36 = arith.constant 8 : i32
    %45 = arith.muli %arg1, %c8_i32_36 : i32
    %c6_i32 = arith.constant 6 : i32
    %46 = arith.addi %45, %c6_i32 : i32
    %c0_37 = arith.constant 0 : index
    %c0_38 = arith.constant 0 : index
    %47 = vector.load %arg10[%c0_37, %c0_38] : memref<8x16xf32, #tpu.memory_space<vmem>>, vector<8x16xf32>
    %c0_39 = arith.constant 0 : index
    %c96 = arith.constant 96 : index
    %48 = vector.load %arg9[%c0_39, %c96] : memref<8x128xf32, #tpu.memory_space<vmem>>, vector<8x16xf32>
    tpu.vector_store %arg9[%c0_39, %c96], %47 {strides = array<i32>} : memref<8x128xf32, #tpu.memory_space<vmem>>, vector<8x16xf32>,
    %c19_i32_40 = arith.constant 19 : i32
    %49 = arith.cmpi slt, %46, %c19_i32_40 : i32
    %50 = arith.extui %49 : i1 to i32
    %c0_i32_41 = arith.constant 0 : i32
    %51 = arith.cmpi ne, %50, %c0_i32_41 : i32
    scf.if %51 {
      %c6 = arith.constant 6 : index
      %c0_48 = arith.constant 0 : index
      %c0_49 = arith.constant 0 : index
      %59 = vector.load %arg2[%c6, %c0_48, %c0_49] : memref<8x16x4xf32, #tpu.memory_space<vmem>>, vector<1x16x4xf32>
      %60 = vector.shape_cast %59 : vector<1x16x4xf32> to vector<16x4xf32>
      %c6_50 = arith.constant 6 : index
      %c0_51 = arith.constant 0 : index
      %c0_52 = arith.constant 0 : index
      %61 = vector.load %arg3[%c6_50, %c0_51, %c0_52] : memref<8x16x4xf32, #tpu.memory_space<vmem>>, vector<1x16x4xf32>
      %62 = vector.shape_cast %61 : vector<1x16x4xf32> to vector<16x4xf32>
      %c6_53 = arith.constant 6 : index
      %c0_54 = arith.constant 0 : index
      %c0_55 = arith.constant 0 : index
      %63 = vector.load %arg4[%c6_53, %c0_54, %c0_55] : memref<8x4x16xf32, #tpu.memory_space<vmem>>, vector<1x4x16xf32>
      %64 = vector.shape_cast %63 : vector<1x4x16xf32> to vector<4x16xf32>
      %c6_56 = arith.constant 6 : index
      %c0_57 = arith.constant 0 : index
      %c0_58 = arith.constant 0 : index
      %65 = vector.load %arg5[%c6_56, %c0_57, %c0_58] : memref<8x4x16xf32, #tpu.memory_space<vmem>>, vector<1x4x16xf32>
      %66 = vector.shape_cast %65 : vector<1x4x16xf32> to vector<4x16xf32>
      %c6_59 = arith.constant 6 : index
      %c0_60 = arith.constant 0 : index
      %c0_61 = arith.constant 0 : index
      %67 = vector.load %arg6[%c6_59, %c0_60, %c0_61] : memref<8x1x4xf32, #tpu.memory_space<vmem>>, vector<1x1x4xf32>
      %68 = vector.shape_cast %67 : vector<1x1x4xf32> to vector<1x4xf32>
      %cst = arith.constant dense<0.000000e+00> : vector<8x4xf32>
      %69 = tpu.matmul %47, %60, %cst {dimension_numbers = #tpu.dot_dimension_numbers<[1], [0], [0], [1], [0, 0, 1, 1], [], []>} : vector<8x16xf32>, vector<16x4xf32>, vector<8x4xf32> -> vector<8x4xf32>
      %70 = arith.mulf %47, %47 : vector<8x16xf32>
      %cst_62 = arith.constant dense<0.000000e+00> : vector<8x4xf32>
      %71 = tpu.matmul %70, %62, %cst_62 {dimension_numbers = #tpu.dot_dimension_numbers<[1], [0], [0], [1], [0, 0, 1, 1], [], []>} : vector<8x16xf32>, vector<16x4xf32>, vector<8x4xf32> -> vector<8x4xf32>
      %cst_63 = arith.constant 5.000000e-01 : f32
      %72 = vector.broadcast %cst_63 : f32 to vector<8x4xf32>
      %73 = arith.mulf %72, %71 : vector<8x4xf32>
      %74 = arith.subf %69, %73 : vector<8x4xf32>
      %75 = vector.broadcast %68 : vector<1x4xf32> to vector<8x4xf32>
      %76 = arith.addf %74, %75 : vector<8x4xf32>
      %cst_64 = arith.constant dense<0xFF800000> : vector<8xf32>
      %77 = vector.multi_reduction <maximumf>, %76, %cst_64 [1] : vector<8x4xf32> to vector<8xf32>
      %78 = vector.shape_cast %77 : vector<8xf32> to vector<8x1xf32>
      %79 = vector.broadcast %78 : vector<8x1xf32> to vector<8x4xf32>
      %80 = arith.subf %76, %79 : vector<8x4xf32>
      %81 = math.exp %80 : vector<8x4xf32>
      %cst_65 = arith.constant dense<0.000000e+00> : vector<8xf32>
      %82 = vector.multi_reduction <add>, %81, %cst_65 [1] : vector<8x4xf32> to vector<8xf32>
      %83 = vector.shape_cast %82 : vector<8xf32> to vector<8x1xf32>
      %84 = tpu.reciprocal %83 {approx = true} : vector<8x1xf32> -> vector<8x1xf32>
      %85 = arith.mulf %83, %84 : vector<8x1xf32>
      %cst_66 = arith.constant 2.000000e+00 : f32
      %86 = vector.broadcast %cst_66 : f32 to vector<8x1xf32>
      %87 = arith.subf %86, %85 : vector<8x1xf32>
      %88 = arith.mulf %84, %87 : vector<8x1xf32>
      %89 = vector.broadcast %88 : vector<8x1xf32> to vector<8x4xf32>
      %90 = arith.mulf %81, %89 : vector<8x4xf32>
      %cst_67 = arith.constant dense<0.000000e+00> : vector<8x16xf32>
      %91 = tpu.matmul %90, %64, %cst_67 {dimension_numbers = #tpu.dot_dimension_numbers<[1], [0], [0], [1], [0, 0, 1, 1], [], []>} : vector<8x4xf32>, vector<4x16xf32>, vector<8x16xf32> -> vector<8x16xf32>
      %cst_68 = arith.constant dense<0.000000e+00> : vector<8x16xf32>
      %92 = tpu.matmul %90, %66, %cst_68 {dimension_numbers = #tpu.dot_dimension_numbers<[1], [0], [0], [1], [0, 0, 1, 1], [], []>} : vector<8x4xf32>, vector<4x16xf32>, vector<8x16xf32> -> vector<8x16xf32>
      %93 = arith.mulf %47, %92 : vector<8x16xf32>
      %94 = arith.subf %91, %93 : vector<8x16xf32>
      %c0_69 = arith.constant 0 : index
      %c96_70 = arith.constant 96 : index
      %95 = vector.load %arg8[%c0_69, %c96_70] : memref<8x128xf32, #tpu.memory_space<vmem>>, vector<8x16xf32>
      %cst_71 = arith.constant 0.00526315812 : f32
      %96 = vector.broadcast %cst_71 : f32 to vector<8x16xf32>
      %97 = arith.mulf %96, %94 : vector<8x16xf32>
      %98 = arith.addf %47, %97 : vector<8x16xf32>
      %cst_72 = arith.constant 0.072547622 : f32
      %99 = vector.broadcast %cst_72 : f32 to vector<8x16xf32>
      %100 = arith.mulf %99, %95 : vector<8x16xf32>
      %101 = arith.addf %98, %100 : vector<8x16xf32>
      %c0_73 = arith.constant 0 : index
      %c0_74 = arith.constant 0 : index
      %102 = vector.load %arg10[%c0_73, %c0_74] : memref<8x16xf32, #tpu.memory_space<vmem>>, vector<8x16xf32>
      tpu.vector_store %arg10[%c0_73, %c0_74], %101 {strides = array<i32>} : memref<8x16xf32, #tpu.memory_space<vmem>>, vector<8x16xf32>,
    } else {
    }
    %c8_i32_42 = arith.constant 8 : i32
    %52 = arith.muli %arg1, %c8_i32_42 : i32
    %c7_i32 = arith.constant 7 : i32
    %53 = arith.addi %52, %c7_i32 : i32
    %c0_43 = arith.constant 0 : index
    %c0_44 = arith.constant 0 : index
    %54 = vector.load %arg10[%c0_43, %c0_44] : memref<8x16xf32, #tpu.memory_space<vmem>>, vector<8x16xf32>
    %c0_45 = arith.constant 0 : index
    %c112 = arith.constant 112 : index
    %55 = vector.load %arg9[%c0_45, %c112] : memref<8x128xf32, #tpu.memory_space<vmem>>, vector<8x16xf32>
    tpu.vector_store %arg9[%c0_45, %c112], %54 {strides = array<i32>} : memref<8x128xf32, #tpu.memory_space<vmem>>, vector<8x16xf32>,
    %c19_i32_46 = arith.constant 19 : i32
    %56 = arith.cmpi slt, %53, %c19_i32_46 : i32
    %57 = arith.extui %56 : i1 to i32
    %c0_i32_47 = arith.constant 0 : i32
    %58 = arith.cmpi ne, %57, %c0_i32_47 : i32
    scf.if %58 {
      %c7 = arith.constant 7 : index
      %c0_48 = arith.constant 0 : index
      %c0_49 = arith.constant 0 : index
      %59 = vector.load %arg2[%c7, %c0_48, %c0_49] : memref<8x16x4xf32, #tpu.memory_space<vmem>>, vector<1x16x4xf32>
      %60 = vector.shape_cast %59 : vector<1x16x4xf32> to vector<16x4xf32>
      %c7_50 = arith.constant 7 : index
      %c0_51 = arith.constant 0 : index
      %c0_52 = arith.constant 0 : index
      %61 = vector.load %arg3[%c7_50, %c0_51, %c0_52] : memref<8x16x4xf32, #tpu.memory_space<vmem>>, vector<1x16x4xf32>
      %62 = vector.shape_cast %61 : vector<1x16x4xf32> to vector<16x4xf32>
      %c7_53 = arith.constant 7 : index
      %c0_54 = arith.constant 0 : index
      %c0_55 = arith.constant 0 : index
      %63 = vector.load %arg4[%c7_53, %c0_54, %c0_55] : memref<8x4x16xf32, #tpu.memory_space<vmem>>, vector<1x4x16xf32>
      %64 = vector.shape_cast %63 : vector<1x4x16xf32> to vector<4x16xf32>
      %c7_56 = arith.constant 7 : index
      %c0_57 = arith.constant 0 : index
      %c0_58 = arith.constant 0 : index
      %65 = vector.load %arg5[%c7_56, %c0_57, %c0_58] : memref<8x4x16xf32, #tpu.memory_space<vmem>>, vector<1x4x16xf32>
      %66 = vector.shape_cast %65 : vector<1x4x16xf32> to vector<4x16xf32>
      %c7_59 = arith.constant 7 : index
      %c0_60 = arith.constant 0 : index
      %c0_61 = arith.constant 0 : index
      %67 = vector.load %arg6[%c7_59, %c0_60, %c0_61] : memref<8x1x4xf32, #tpu.memory_space<vmem>>, vector<1x1x4xf32>
      %68 = vector.shape_cast %67 : vector<1x1x4xf32> to vector<1x4xf32>
      %cst = arith.constant dense<0.000000e+00> : vector<8x4xf32>
      %69 = tpu.matmul %54, %60, %cst {dimension_numbers = #tpu.dot_dimension_numbers<[1], [0], [0], [1], [0, 0, 1, 1], [], []>} : vector<8x16xf32>, vector<16x4xf32>, vector<8x4xf32> -> vector<8x4xf32>
      %70 = arith.mulf %54, %54 : vector<8x16xf32>
      %cst_62 = arith.constant dense<0.000000e+00> : vector<8x4xf32>
      %71 = tpu.matmul %70, %62, %cst_62 {dimension_numbers = #tpu.dot_dimension_numbers<[1], [0], [0], [1], [0, 0, 1, 1], [], []>} : vector<8x16xf32>, vector<16x4xf32>, vector<8x4xf32> -> vector<8x4xf32>
      %cst_63 = arith.constant 5.000000e-01 : f32
      %72 = vector.broadcast %cst_63 : f32 to vector<8x4xf32>
      %73 = arith.mulf %72, %71 : vector<8x4xf32>
      %74 = arith.subf %69, %73 : vector<8x4xf32>
      %75 = vector.broadcast %68 : vector<1x4xf32> to vector<8x4xf32>
      %76 = arith.addf %74, %75 : vector<8x4xf32>
      %cst_64 = arith.constant dense<0xFF800000> : vector<8xf32>
      %77 = vector.multi_reduction <maximumf>, %76, %cst_64 [1] : vector<8x4xf32> to vector<8xf32>
      %78 = vector.shape_cast %77 : vector<8xf32> to vector<8x1xf32>
      %79 = vector.broadcast %78 : vector<8x1xf32> to vector<8x4xf32>
      %80 = arith.subf %76, %79 : vector<8x4xf32>
      %81 = math.exp %80 : vector<8x4xf32>
      %cst_65 = arith.constant dense<0.000000e+00> : vector<8xf32>
      %82 = vector.multi_reduction <add>, %81, %cst_65 [1] : vector<8x4xf32> to vector<8xf32>
      %83 = vector.shape_cast %82 : vector<8xf32> to vector<8x1xf32>
      %84 = tpu.reciprocal %83 {approx = true} : vector<8x1xf32> -> vector<8x1xf32>
      %85 = arith.mulf %83, %84 : vector<8x1xf32>
      %cst_66 = arith.constant 2.000000e+00 : f32
      %86 = vector.broadcast %cst_66 : f32 to vector<8x1xf32>
      %87 = arith.subf %86, %85 : vector<8x1xf32>
      %88 = arith.mulf %84, %87 : vector<8x1xf32>
      %89 = vector.broadcast %88 : vector<8x1xf32> to vector<8x4xf32>
      %90 = arith.mulf %81, %89 : vector<8x4xf32>
      %cst_67 = arith.constant dense<0.000000e+00> : vector<8x16xf32>
      %91 = tpu.matmul %90, %64, %cst_67 {dimension_numbers = #tpu.dot_dimension_numbers<[1], [0], [0], [1], [0, 0, 1, 1], [], []>} : vector<8x4xf32>, vector<4x16xf32>, vector<8x16xf32> -> vector<8x16xf32>
      %cst_68 = arith.constant dense<0.000000e+00> : vector<8x16xf32>
      %92 = tpu.matmul %90, %66, %cst_68 {dimension_numbers = #tpu.dot_dimension_numbers<[1], [0], [0], [1], [0, 0, 1, 1], [], []>} : vector<8x4xf32>, vector<4x16xf32>, vector<8x16xf32> -> vector<8x16xf32>
      %93 = arith.mulf %54, %92 : vector<8x16xf32>
      %94 = arith.subf %91, %93 : vector<8x16xf32>
      %c0_69 = arith.constant 0 : index
      %c112_70 = arith.constant 112 : index
      %95 = vector.load %arg8[%c0_69, %c112_70] : memref<8x128xf32, #tpu.memory_space<vmem>>, vector<8x16xf32>
      %cst_71 = arith.constant 0.00526315812 : f32
      %96 = vector.broadcast %cst_71 : f32 to vector<8x16xf32>
      %97 = arith.mulf %96, %94 : vector<8x16xf32>
      %98 = arith.addf %54, %97 : vector<8x16xf32>
      %cst_72 = arith.constant 0.072547622 : f32
      %99 = vector.broadcast %cst_72 : f32 to vector<8x16xf32>
      %100 = arith.mulf %99, %95 : vector<8x16xf32>
      %101 = arith.addf %98, %100 : vector<8x16xf32>
      %c0_73 = arith.constant 0 : index
      %c0_74 = arith.constant 0 : index
      %102 = vector.load %arg10[%c0_73, %c0_74] : memref<8x16xf32, #tpu.memory_space<vmem>>, vector<8x16xf32>
      tpu.vector_store %arg10[%c0_73, %c0_74], %101 {strides = array<i32>} : memref<8x16xf32, #tpu.memory_space<vmem>>, vector<8x16xf32>,
    } else {
    }
    return
  }
  func.func @transform_0(%arg0: i32, %arg1: i32) -> (i32, i32, i32) {
    %c0_i32 = arith.constant 0 : i32
    %c0_i32_0 = arith.constant 0 : i32
    %c0_i32_1 = arith.constant 0 : i32
    return %arg1, %c0_i32, %c0_i32_0 : i32, i32, i32
  }
  func.func @transform_1(%arg0: i32, %arg1: i32) -> (i32, i32, i32) {
    %c0_i32 = arith.constant 0 : i32
    %c0_i32_0 = arith.constant 0 : i32
    %c0_i32_1 = arith.constant 0 : i32
    return %arg1, %c0_i32, %c0_i32_0 : i32, i32, i32
  }
  func.func @transform_2(%arg0: i32, %arg1: i32) -> (i32, i32, i32) {
    %c0_i32 = arith.constant 0 : i32
    %c0_i32_0 = arith.constant 0 : i32
    %c0_i32_1 = arith.constant 0 : i32
    return %arg1, %c0_i32, %c0_i32_0 : i32, i32, i32
  }
  func.func @transform_3(%arg0: i32, %arg1: i32) -> (i32, i32, i32) {
    %c0_i32 = arith.constant 0 : i32
    %c0_i32_0 = arith.constant 0 : i32
    %c0_i32_1 = arith.constant 0 : i32
    return %arg1, %c0_i32, %c0_i32_0 : i32, i32, i32
  }
  func.func @transform_4(%arg0: i32, %arg1: i32) -> (i32, i32, i32) {
    %c0_i32 = arith.constant 0 : i32
    %c0_i32_0 = arith.constant 0 : i32
    %c0_i32_1 = arith.constant 0 : i32
    return %arg1, %c0_i32, %c0_i32_0 : i32, i32, i32
  }
  func.func @transform_5(%arg0: i32, %arg1: i32) -> (i32, i32) {
    %c0_i32 = arith.constant 0 : i32
    %c0_i32_0 = arith.constant 0 : i32
    return %arg0, %c0_i32 : i32, i32
  }
  func.func @transform_6(%arg0: i32, %arg1: i32) -> (i32, i32) {
    %c0_i32 = arith.constant 0 : i32
    return %arg0, %arg1 : i32, i32
  }
  func.func @transform_7(%arg0: i32, %arg1: i32) -> (i32, i32) {
    %c0_i32 = arith.constant 0 : i32
    return %arg0, %arg1 : i32, i32
  }
}

</mosaic_0001>

<bundles_post_ra>
// kernel: tpu_custom_call.1
= control target key start
LH: loop header
LB: loop body
LE: loop exit
PB: predicated region body
PF: predicated region fallthrough
CT: control target
= control target key end

     0   :  { %s4590_s0 = inlined_call_operand.vmem [shape: f32[24,16,4], index: 0, kind: input, shape index: {}]   ;;  %s4591_s1 = inlined_call_operand.vmem [shape: f32[24,16,4], index: 1, kind: input, shape index: {}]   ;;  %s4592_s2 = inlined_call_operand.vmem [shape: f32[24,4,16], index: 2, kind: input, shape index: {}]   ;;  %s4593_s3 = inlined_call_operand.vmem [shape: f32[24,4,16], index: 3, kind: input, shape index: {}]   ;;  %s4594_s4 = inlined_call_operand.vmem [shape: f32[24,1,4], index: 4, kind: input, shape index: {}]   ;;  %s4595_s5 = inlined_call_operand.vmem [shape: f32[16,16], index: 5, kind: input, shape index: {}]   ;;  %s4596_s6 = inlined_call_operand.vmem [shape: f32[16,304], index: 6, kind: input, shape index: {}]   ;;  %s4597_s7 = inlined_call_operand.hbm [shape: f32[16,320], index: 7, kind: output, shape index: {}]  }
   0x1   :  { %4611 = sst [smem:[#allocation16_spill]] %s4590_s0 }
   0x2   :  { %4612 = sst [smem:[#allocation17_spill]] %s4591_s1 }
   0x3   :  { %4613 = sst [smem:[#allocation18_spill]] %s4592_s2 }
   0x4   :  { %4614 = sst [smem:[#allocation19_spill]] %s4597_s7 }
   0x5   :  { %12 = vsyncpa [#allocation4], 0 }
   0x6   :  { %14 = vsyncpa [#allocation4 + $0x1], 0  ;;  %s4216_s24 = smov 0   ;;  %s4218_s25 = smov 0  }
   0x7   :  { %s4220_s26 = smov 0   ;;  %s4222_s27 = smov 0  }
   0x8   :  { %s4224_s28 = smov 0   ;;  %s4226_s29 = smov 0  }
   0x9   :  { %s4228_s30 = smov 0   ;;  %s4230_s8 = smov 0  }
   0xa LB: > { %4615 = sst [smem:[#allocation6_spill]] %s4107_s24  ;;  %s3438_s9 = sadd.s32 4294967295, %s4135_s8   ;;  %s4135_s8 = sphi %s4230_s8, %s20_s8   ;;  %s4131_s30 = sphi %s4228_s30, %s4641_s30   ;;  %s4127_s29 = sphi %s4226_s29, %s4640_s29   ;;  %s4123_s28 = sphi %s4224_s28, %s4639_s28   ;;  %s4119_s27 = sphi %s4222_s27, %s4638_s27   ;;  %s4115_s26 = sphi %s4220_s26, %s4637_s26   ;;  %s4111_s25 = sphi %s4218_s25, %s4643_s25   ;;  %s4107_s24 = sphi %s4216_s24, %s4642_s24  }
   0xb   : > { %4616 = sst [smem:[#allocation7_spill]] %s4115_s26  ;;  %s3439_s10 = sadd.s32 4294967294, %s4135_s8  }
   0xc   : > { %4617 = sst [smem:[#allocation8_spill]] %s4127_s29  ;;  %s29_s11 = sadd.s32 1, %s4127_s29 }
   0xd   : > { %4618 = sst [smem:[#allocation9_spill]] %s4131_s30  ;;  %p30_p0 = scmp.ge.s32.totalorder %s29_s11, 3 }
   0xe   : > { %4619 = sst [smem:[#allocation10_spill]] %s4135_s8  ;;  %s32_s12 = sadd.s32 1, %s4131_s30 }
   0xf   : > { %p235_p1 = scmp.ne.s32.totalorder %s4115_s26, %s4111_s25  ;;  %p236_p2 = scmp.eq.s32.totalorder %s3438_s9, 5 }
  0x10   : > { %s4645_s11 = smov (%p30_p0, %s29_s11), 0  ;;  %s4647_s12 = smov (!%p30_p0, %s32_s12), %s4131_s30 }
  0x11   : > { %4620 = sst [smem:[#allocation11_spill]] %s4645_s11  ;;  %s221_s13 = ssub.s32 %s4127_s29, %s4645_s11 }
  0x12   : > { %p4267_p3 = por %p236_p2, %p235_p1  ;;  %p34_p4 = scmp.ge.s32.totalorder %s4647_s12, 2 }
  0x13   : > { %p241_p5 = scmp.ne.s32.totalorder %s4111_s25, %s4107_s24  ;;  %p242_p6 = scmp.eq.s32.totalorder %s3439_s10, 5 }
  0x14   : > { %s4621_s14 = scalar_select %p4267_p3, 1, 0 }
  0x15   : > { %p3442_p7 = scmp.ge.s32.totalorder %s4135_s8, 1  ;;  %s4649_s12 = smov (%p34_p4, %s4647_s12), 0 }
  0x16   : > { %4622 = sst [smem:[#allocation12_spill]] %s4621_s14  ;;  %p4276_p8 = por %p242_p6, %p241_p5 }
  0x17   : > { %4623 = sst [smem:[#allocation13_spill]] %s4649_s12  ;;  %p324_p9 = scmp.lt.s32.totalorder %s4135_s8, 7 }
  0x18   : > { %s4624_s15 = scalar_select %p4276_p8, 1, 0 }
  0x19   : > { %s220_s16 = ssub.s32 %s4131_s30, %s4649_s12  ;;  %s225_s17 = sadd.s32 1, %s4115_s26 }
  0x1a   : > { %4625 = sst [smem:[#allocation14_spill]] %s4624_s15  ;;  %s222_s18 = sor.u32 %s221_s13, %s220_s16 }
  0x1b   : > { %p325_p10 = pnand %p3442_p7, %p324_p9  ;;  %p223_p11 = scmp.eq.s32.totalorder %s222_s18, 0 }
  0x1c   : > { %s4602_s20 = sand.u32 (!%p325_p10), 1, %s4111_s25   ;;  %s4289_s21 = sshll.u32 (!%p325_p10), %s4119_s27, 3 }
  0x1d   : > { %s4285_s19 = scalar_select %p223_p11, %s4115_s26, %s225_s17  }
  0x1e   : > { %328 = sbr.rel (%p325_p10) target bundleno = 6238 (0x185e), region = 48  ;;  %s3443_s22 = sshll.u32 (!%p325_p10), %s4602_s20, 3 }
  0x1f   : > { %4626 = sst [smem:[#allocation15_spill]] %s4285_s19  ;;  %p390_p12 = scmp.lt.s32.totalorder (!%p325_p10), %s4289_s21, 23 }
  0x20   : > { %p420_p13 = scmp.lt.s32.totalorder (!%p325_p10), %s4123_s28, 1  ;;  %s4627_s0 = sld [smem:[#allocation16_spill]] (!%p325_p10) }
  0x21   : > { %s4628_s1 = sld [smem:[#allocation17_spill]] (!%p325_p10)  ;;  %s4629_s2 = sld [smem:[#allocation18_spill]] (!%p325_p10) }
  0x22   : > { %p426_p0 = scmp.lt.s32.totalorder (!%p325_p10), %s4119_s27, 2  ;;  %s4332_s15 = scalar_lea.vmem (!%p325_p10), [#allocation3], %s3443_s22 }
  0x23   : > { %p3457_p1 = scmp.ne.s32.totalorder (!%p325_p10), %s4119_s27, 0 }
  0x25   : > { %s391_s23 = scalar_select %p390_p12, %s4289_s21, 23 }
  0x26   : > { %s421_s9 = scalar_select %p420_p13, %s4123_s28, 1 }
  0x27   : > { %s3576_s10 = sshll.u32 %s391_s23, 4  ;;  %s3451_s13 = sshll.u32 %s391_s23, 2  ;;  %vm437_vm0 = vcmask (!%p3457_p1), 130048  }
  0x28   : > { %s4300_s18 = scalar_lea.vmem %s4627_s0, %s3576_s10  ;;  %s4305_s30 = scalar_lea.vmem %s4628_s1, %s3576_s10 }
  0x29   : > { %s4310_s20 = scalar_lea.vmem %s4629_s2, %s3451_s13  ;;  %s4315_s24 = scalar_lea.vmem %s4593_s3, %s3451_s13 }
  0x2a   : > { %s4320_s16 = scalar_lea.vmem %s4594_s4, %s391_s23  ;;  %s3455_s17 = sshll.u32 %s421_s9, 3 }
  0x2b   : > { %s423_s12 = scalar_lea.vmem %s4595_s5, %s3455_s17  ;;  %s3898_s10 = smul.u32 3, %s421_s9 }
  0x2c   : > { %s427_s29 = scalar_select %p426_p0, %s4119_s27, 2 }
  0x2d   : > { %435 = sbr.rel (%p3457_p1) target bundleno = 52 (0x34), region = 52  ;;  %v436_v0 = vld [vmem:[%s423_s12] sm:$0xff] (!%p3457_p1) }
  0x2e   : > { %s429_s19 = sadd.s32 %s3898_s10, %s427_s29  ;;  %438 = vst.msk [vmem:[#allocation2] sm:$0xff] (!%p3457_p1), %vm437_vm0, %v436_v0 }
  0x2f   : > { %s3456_s1 = sshll.u32 %s429_s19, 3 }
  0x30   : > { %s4330_s26 = scalar_lea.vmem %s4596_s6, %s3456_s1 }
  0x34 PF: > { %vm441_vm1 = vcmask 130048   ;;  %p3459_p2 = scmp.ge.s32.totalorder %s4289_s21, 19 }
  0x35   : > { %v4335_v1 = vld [vmem:[#allocation2] sm:$0xff]  ;;  %v450_v3 = vld [vmem:[%s4305_s30 + $0x8] sm:$0xff] (!%p3459_p2)  ;;  %v4137_v5 = vmov (!%p3459_p2), 0.0|0.0   ;;  %vm4138_vm2 = vmmov (!%p3459_p2), 0   ;;  %v4139_v9 = vmov (!%p3459_p2), 0.0   ;;  %vm610_vm3 = vcmask (!%p3459_p2), 31744  }
  0x36   : > { %442 = vst.msk [vmem:[%s4332_s15] sm:$0xff] %vm441_vm1, %v4335_v1  ;;  %446 = sbr.rel (%p3459_p2) target bundleno = 821 (0x335), region = 56  ;;  %v449_v2 = vld [vmem:[%s4305_s30] sm:$0xff] (!%p3459_p2)  ;;  %3853 = vmatprep.subr.bf16.mxu1 (!%p3459_p2), %v4137_v5  ;;  %3850 = vmatprep.subr.bf16.mxu0 (!%p3459_p2), %v4137_v5  ;;  %v448_v7 = vld [vmem:[%s4300_s18 + $0x8] sm:$0xff] (!%p3459_p2)  ;;  %v527_v10 = vmul.f32 (!%p3459_p2), %v4335_v1, %v4335_v1  ;;  %vm628_vm4 = vcmask (!%p3459_p2), 1043456  }
  0x37   : > { %v447_v4 = vld [vmem:[%s4300_s18] sm:$0xff] (!%p3459_p2)  ;;  %v3854_v6 = vpack.c.bf16 (!%p3459_p2), %v450_v3, %v449_v2  ;;  %3669 = vmatprep.mubr.msk.f32.mxu1 (!%p3459_p2), %vm4138_vm2, %v4139_v9  ;;  %3662 = vmatprep.mubr.msk.f32.mxu0 (!%p3459_p2), %vm4138_vm2, %v4139_v9 }
  0x38   : > { %v3851_v8 = vpack.c.bf16 (!%p3459_p2), %v448_v7, %v447_v4  ;;  %v3462_v16 = vld [vmem:[%s4320_s16] ss:$0 sm:$0xff] (!%p3459_p2) }
  0x39   : > { %3855 = vmatpush3.bf16.msra.mxu1 (!%p3459_p2), %v3854_v6  ;;  %v452_v25 = vld [vmem:[%s4315_s24] sm:$0xf] (!%p3459_p2) }
  0x3a   : > { %3852 = vmatpush3.bf16.msra.mxu0 (!%p3459_p2), %v3851_v8  ;;  %3677 = vmatprep.subr.mxu1 (!%p3459_p2), %v4139_v9  ;;  %v451_v26 = vld [vmem:[%s4310_s20] sm:$0xf] (!%p3459_p2) }
  0x3b   : > { %3672 = vmatprep.subr.mxu0 (!%p3459_p2), %v4139_v9  ;;  %v777_v38 = vld [vmem:[%s4330_s26] sm:$0xff] (!%p3459_p2) }
  0x3c   : > { %3670 = vmatmul.mubr.msk.f32.vlgmr.msra.gmra.mrb[0].mxu1 (!%p3459_p2), %vm441_vm1, %v527_v10  ;;  %v780_v41 = vmul.f32 (!%p3459_p2), 0.07254762, %v777_v38 }
  0x3d   : > { %3663 = vmatmul.mubr.msk.f32.vlgmr.msra.gmra.mrb[0].mxu0 %vm441_vm1, %v4335_v1  ;;  %3679 = vmatprep.mubr.msk.f32.mxu1 %vm4138_vm2, %v4139_v9 }
  0x3e   : > { %3674 = vmatprep.mubr.msk.f32.mxu0 %vm4138_vm2, %v4139_v9  ;;  %3678 = vmatpush3.msk.msra.mxu1 %vm628_vm4, %v452_v25 }
  0x3f   : > { %3673 = vmatpush3.msk.msra.mxu0 %vm628_vm4, %v451_v26 }
 0x10f   : > { %v597_v11 = vpop.f32.mrb[0].mxu1 }
 0x110   : > { %v601_v12 = vmul.f32 0.5, %v597_v11  ;;  %v523_v13 = vpop.f32.mrb[0].mxu0  ;;  %v3671_v14 = vpop.f32.mrb[1].mxu1 }
 0x111   : > { %v3664_v15 = vpop.f32.mrb[1].mxu0 }
 0x112   : > { %v602_v17 = vsub.f32 %v523_v13, %v601_v12 }
 0x114   : > { %v609_v18 = vadd.f32 %v3462_v16, %v602_v17 }
 0x116   : > { %v611_v19 = vsel %vm610_vm3, %v609_v18, -inf }
 0x117   : > { %612 = vmax.xlane.f32.xlu0 %v611_v19 }
 0x1a4   : > { %v613_v20 = vpop.xlane.xlu0 %612 }
 0x1a5   : > { %v614_v21 = vsub.f32 %v609_v18, %v613_v20 }
 0x1a7   : > { %v615_v22 = vmul.f32 1.442695, %v614_v21 }
 0x1a9   : > { %4009 = vpow2.f32 %v615_v22 }
 0x1b3   : > { %v4010_v23 = vpop.eup %4009 }
 0x1b4   : > { %v617_v24 = vsel %vm610_vm3, %v4010_v23, 0.0 }
 0x1b5   : > { %618 = vadd.xlane.f32.xlu0 %v617_v24 }
 0x242   : > { %v619_v27 = vpop.xlane.xlu0 %618 }
 0x243   : > { %4011 = vrcp.f32 %v619_v27 }
 0x24d   : > { %v4012_v28 = vpop.eup %4011 }
 0x24e   : > { %v621_v29 = vmul.f32 %v4012_v28, %v619_v27 }
 0x250   : > { %v622_v30 = vsub.f32 2.0, %v621_v29 }
 0x252   : > { %v623_v31 = vmul.f32 %v4012_v28, %v622_v30 }
 0x254   : > { %v624_v32 = vmul.f32 %v4010_v23, %v623_v31 }
 0x256   : > { %3675 = vmatmul.mubr.msk.f32.vlgmr.msra.gmra.mrb[2].mxu0 %vm610_vm3, %v624_v32  ;;  %3680 = vmatmul.mubr.msk.f32.vlgmr.msra.gmra.mrb[2].mxu1 %vm610_vm3, %v624_v32 }
 0x329   : > { %v698_v33 = vpop.f32.mrb[2].mxu0  ;;  %v771_v34 = vpop.f32.mrb[2].mxu1 }
 0x32a   : > { %v775_v35 = vmul.f32 %v771_v34, %v4335_v1  ;;  %v3676_v36 = vpop.f32.mrb[3].mxu0  ;;  %v3681_v37 = vpop.f32.mrb[3].mxu1 }
 0x32c   : > { %v776_v39 = vsub.f32 %v698_v33, %v775_v35 }
 0x32e   : > { %v778_v40 = vmul.f32 0.005263158, %v776_v39 }
 0x330   : > { %v779_v42 = vadd.f32 %v778_v40, %v4335_v1 }
 0x332   : > { %v781_v43 = vadd.f32 %v780_v41, %v779_v42 }
 0x334   : > { %782 = vst.msk [vmem:[#allocation2] sm:$0xff] %vm441_vm1, %v781_v43 }
 0x335 PF: > { %s783_s0 = sadd.s32 1, %s4289_s21  ;;  %s4140_s1 = smov 16   ;;  %vm789_vm5 = vcmask 261248  }
 0x336   : > { %p3467_p4 = scmp.ge.s32.totalorder %s783_s0, 19 }
 0x337   : > { %v3470_v46 = vld [vmem:[%s4305_s30 + $0x10] sm:$0xff] (!%p3467_p4)  ;;  %v3471_v47 = vld [vmem:[%s4305_s30 + $0x18] sm:$0xff] (!%p3467_p4)  ;;  %v4141_v49 = vmov (!%p3467_p4), 0.0|0.0   ;;  %vm4142_vm6 = vmmov (!%p3467_p4), 0   ;;  %v4143_v53 = vmov (!%p3467_p4), 0.0   ;;  %vm962_vm7 = vcmask (!%p3467_p4), 31744  }
 0x338   : > { %v3468_v48 = vld [vmem:[%s4300_s18 + $0x10] sm:$0xff] (!%p3467_p4)  ;;  %3859 = vmatprep.subr.bf16.mxu1 (!%p3467_p4), %v4141_v49  ;;  %3856 = vmatprep.subr.bf16.mxu0 (!%p3467_p4), %v4141_v49  ;;  %v3860_v50 = vpack.c.bf16 (!%p3467_p4), %v3471_v47, %v3470_v46  ;;  %v3469_v51 = vld [vmem:[%s4300_s18 + $0x18] sm:$0xff] (!%p3467_p4)  ;;  %v3477_v60 = vld [vmem:[%s4320_s16 + $0x1] ss:$0 sm:$0xff] (!%p3467_p4)  ;;  %vm980_vm8 = vcmask (!%p3467_p4), 1043456   ;;  %s4144_s2 = smov (!%p3467_p4), 112  }
 0x339   : > { %v3857_v52 = vpack.c.bf16 (!%p3467_p4), %v3469_v51, %v3468_v48  ;;  %3693 = vmatprep.mubr.msk.f32.mxu1 (!%p3467_p4), %vm4142_vm6, %v4143_v53  ;;  %3686 = vmatprep.mubr.msk.f32.mxu0 (!%p3467_p4), %vm4142_vm6, %v4143_v53  ;;  %v3473_v5 = vld [vmem:[%s4315_s24 + $0x4] sm:$0xf] (!%p3467_p4) }
 0x33a   : > { %3861 = vmatpush3.bf16.msra.mxu1 (!%p3467_p4), %v3860_v50  ;;  %v3472_v6 = vld [vmem:[%s4310_s20 + $0x4] sm:$0xf] (!%p3467_p4) }
 0x33b   : > { %v4362_v44 = vld [vmem:[#allocation2] sm:$0xff]  ;;  %3858 = vmatpush3.bf16.msra.mxu0 (!%p3467_p4), %v3857_v52  ;;  %3701 = vmatprep.subr.mxu1 (!%p3467_p4), %v4143_v53 }
 0x33c   : > { %786 = vrot.lane.b32.xlu0 %v4362_v44, %s4140_s1  ;;  %v879_v54 = vmul.f32 (!%p3467_p4), %v4362_v44, %v4362_v44  ;;  %3696 = vmatprep.subr.mxu0 (!%p3467_p4), %v4143_v53  ;;  %v1129_v7 = vld [vmem:[%s4330_s26] sm:$0xff] (!%p3467_p4) }
 0x33d   : > { %v1132_v8 = vmul.f32 (!%p3467_p4), 0.07254762, %v1129_v7 }
 0x33e   : > { %3694 = vmatmul.mubr.msk.f32.vlgmr.msra.gmra.mrb[0].mxu1 (!%p3467_p4), %vm441_vm1, %v879_v54  ;;  %3687 = vmatmul.mubr.msk.f32.vlgmr.msra.gmra.mrb[0].mxu0 (!%p3467_p4), %vm441_vm1, %v4362_v44 }
 0x33f   : > { %3703 = vmatprep.mubr.msk.f32.mxu1 (!%p3467_p4), %vm4142_vm6, %v4143_v53  ;;  %3698 = vmatprep.mubr.msk.f32.mxu0 (!%p3467_p4), %vm4142_vm6, %v4143_v53 }
 0x340   : > { %3702 = vmatpush3.msk.msra.mxu1 (!%p3467_p4), %vm980_vm8, %v3473_v5  ;;  %3697 = vmatpush3.msk.msra.mxu0 (!%p3467_p4), %vm980_vm8, %v3472_v6 }
 0x341   : > { %1134 = vrot.lane.b32.xlu1 (!%p3467_p4), %v1132_v8, %s4144_s2 }
 0x3a9   : > { %794 = sbr.rel (%p3467_p4) target bundleno = 1591 (0x637), region = 60 }
 0x3ae   : > { %v787_v45 = vpop.permute.xlu0 %786 }
 0x3af   : > { %790 = vst.msk [vmem:[%s4332_s15] sm:$0xff] %vm789_vm5, %v787_v45 }
 0x3b3   : > { %v1135_v22 = vpop.permute.xlu1 %1134 }
 0x411   : > { %v949_v55 = vpop.f32.mrb[0].mxu1  ;;  %v875_v57 = vpop.f32.mrb[0].mxu0 }
 0x412   : > { %v953_v56 = vmul.f32 0.5, %v949_v55  ;;  %v3695_v58 = vpop.f32.mrb[1].mxu1  ;;  %v3688_v59 = vpop.f32.mrb[1].mxu0 }
 0x414   : > { %v954_v61 = vsub.f32 %v875_v57, %v953_v56 }
 0x416   : > { %v961_v62 = vadd.f32 %v3477_v60, %v954_v61 }
 0x418   : > { %v963_v63 = vsel %vm962_vm7, %v961_v62, -inf }
 0x419   : > { %964 = vmax.xlane.f32.xlu0 %v963_v63 }
 0x4a6   : > { %v965_v0 = vpop.xlane.xlu0 %964 }
 0x4a7   : > { %v966_v1 = vsub.f32 %v961_v62, %v965_v0 }
 0x4a9   : > { %v967_v2 = vmul.f32 1.442695, %v966_v1 }
 0x4ab   : > { %4013 = vpow2.f32 %v967_v2 }
 0x4b5   : > { %v4014_v3 = vpop.eup %4013 }
 0x4b6   : > { %v969_v4 = vsel %vm962_vm7, %v4014_v3, 0.0 }
 0x4b7   : > { %970 = vadd.xlane.f32.xlu0 %v969_v4 }
 0x544   : > { %v971_v9 = vpop.xlane.xlu0 %970 }
 0x545   : > { %4015 = vrcp.f32 %v971_v9 }
 0x54f   : > { %v4016_v10 = vpop.eup %4015 }
 0x550   : > { %v973_v11 = vmul.f32 %v4016_v10, %v971_v9 }
 0x552   : > { %v974_v12 = vsub.f32 2.0, %v973_v11 }
 0x554   : > { %v975_v13 = vmul.f32 %v4016_v10, %v974_v12 }
 0x556   : > { %v976_v14 = vmul.f32 %v4014_v3, %v975_v13 }
 0x558   : > { %3699 = vmatmul.mubr.msk.f32.vlgmr.msra.gmra.mrb[2].mxu0 %vm962_vm7, %v976_v14  ;;  %3704 = vmatmul.mubr.msk.f32.vlgmr.msra.gmra.mrb[2].mxu1 %vm962_vm7, %v976_v14 }
 0x62b   : > { %v1050_v15 = vpop.f32.mrb[2].mxu0  ;;  %v1123_v16 = vpop.f32.mrb[2].mxu1 }
 0x62c   : > { %v1127_v17 = vmul.f32 %v1123_v16, %v4362_v44  ;;  %v3700_v18 = vpop.f32.mrb[3].mxu0  ;;  %v3705_v19 = vpop.f32.mrb[3].mxu1 }
 0x62e   : > { %v1128_v20 = vsub.f32 %v1050_v15, %v1127_v17 }
 0x630   : > { %v1130_v21 = vmul.f32 0.005263158, %v1128_v20 }
 0x632   : > { %v1131_v23 = vadd.f32 %v1130_v21, %v4362_v44 }
 0x634   : > { %v1137_v24 = vadd.f32 %v1135_v22, %v1131_v23 }
 0x636   : > { %1138 = vst.msk [vmem:[#allocation2] sm:$0xff] %vm441_vm1, %v1137_v24 }
 0x637 PF: > { %s1139_s7 = sadd.s32 2, %s4289_s21  ;;  %s4145_s8 = smov 32   ;;  %vm1145_vm9 = vcmask 392448  }
 0x638   : > { %p3482_p5 = scmp.ge.s32.totalorder %s1139_s7, 19 }
 0x639   : > { %v3485_v27 = vld [vmem:[%s4305_s30 + $0x20] sm:$0xff] (!%p3482_p5)  ;;  %v3486_v28 = vld [vmem:[%s4305_s30 + $0x28] sm:$0xff] (!%p3482_p5)  ;;  %v4146_v30 = vmov (!%p3482_p5), 0.0|0.0   ;;  %vm4147_vm10 = vmmov (!%p3482_p5), 0   ;;  %v4148_v34 = vmov (!%p3482_p5), 0.0   ;;  %vm1318_vm11 = vcmask (!%p3482_p5), 31744  }
 0x63a   : > { %v3483_v29 = vld [vmem:[%s4300_s18 + $0x20] sm:$0xff] (!%p3482_p5)  ;;  %3865 = vmatprep.subr.bf16.mxu1 (!%p3482_p5), %v4146_v30  ;;  %3862 = vmatprep.subr.bf16.mxu0 (!%p3482_p5), %v4146_v30  ;;  %v3866_v31 = vpack.c.bf16 (!%p3482_p5), %v3486_v28, %v3485_v27  ;;  %v3484_v32 = vld [vmem:[%s4300_s18 + $0x28] sm:$0xff] (!%p3482_p5)  ;;  %vm1336_vm12 = vcmask (!%p3482_p5), 1043456   ;;  %s4149_s14 = smov (!%p3482_p5), 96  }
 0x63b   : > { %v3863_v33 = vpack.c.bf16 (!%p3482_p5), %v3484_v32, %v3483_v29  ;;  %3717 = vmatprep.mubr.msk.f32.mxu1 (!%p3482_p5), %vm4147_vm10, %v4148_v34  ;;  %3710 = vmatprep.mubr.msk.f32.mxu0 (!%p3482_p5), %vm4147_vm10, %v4148_v34  ;;  %v3492_v41 = vld [vmem:[%s4320_s16 + $0x2] ss:$0 sm:$0xff] (!%p3482_p5)  ;;  %v3488_v50 = vld [vmem:[%s4315_s24 + $0x8] sm:$0xf] (!%p3482_p5) }
 0x63c   : > { %3867 = vmatpush3.bf16.msra.mxu1 (!%p3482_p5), %v3866_v31  ;;  %v3487_v51 = vld [vmem:[%s4310_s20 + $0x8] sm:$0xf] (!%p3482_p5)  ;;  %v1485_v52 = vld [vmem:[%s4330_s26] sm:$0xff] (!%p3482_p5) }
 0x63d   : > { %v4387_v25 = vld [vmem:[#allocation2] sm:$0xff]  ;;  %3864 = vmatpush3.bf16.msra.mxu0 (!%p3482_p5), %v3863_v33  ;;  %3725 = vmatprep.subr.mxu1 (!%p3482_p5), %v4148_v34  ;;  %v1488_v53 = vmul.f32 (!%p3482_p5), 0.07254762, %v1485_v52 }
 0x63e   : > { %1142 = vrot.lane.b32.xlu0 %v4387_v25, %s4145_s8  ;;  %v1235_v35 = vmul.f32 (!%p3482_p5), %v4387_v25, %v4387_v25  ;;  %3720 = vmatprep.subr.mxu0 (!%p3482_p5), %v4148_v34 }
 0x63f   : > { %1490 = vrot.lane.b32.xlu1 (!%p3482_p5), %v1488_v53, %s4149_s14 }
 0x640   : > { %3718 = vmatmul.mubr.msk.f32.vlgmr.msra.gmra.mrb[0].mxu1 (!%p3482_p5), %vm441_vm1, %v1235_v35  ;;  %3711 = vmatmul.mubr.msk.f32.vlgmr.msra.gmra.mrb[0].mxu0 (!%p3482_p5), %vm441_vm1, %v4387_v25 }
 0x641   : > { %3727 = vmatprep.mubr.msk.f32.mxu1 (!%p3482_p5), %vm4147_vm10, %v4148_v34  ;;  %3722 = vmatprep.mubr.msk.f32.mxu0 (!%p3482_p5), %vm4147_vm10, %v4148_v34 }
 0x642   : > { %3726 = vmatpush3.msk.msra.mxu1 (!%p3482_p5), %vm1336_vm12, %v3488_v50  ;;  %3721 = vmatpush3.msk.msra.mxu0 (!%p3482_p5), %vm1336_vm12, %v3487_v51 }
 0x6ab   : > { %1150 = sbr.rel (%p3482_p5) target bundleno = 2361 (0x939), region = 64 }
 0x6b0   : > { %v1143_v26 = vpop.permute.xlu0 %1142 }
 0x6b1   : > { %1146 = vst.msk [vmem:[%s4332_s15] sm:$0xff] %vm1145_vm9, %v1143_v26  ;;  %v1491_v3 = vpop.permute.xlu1 (!%p3482_p5), %1490 }
 0x713   : > { %v1305_v36 = vpop.f32.mrb[0].mxu1  ;;  %v1231_v38 = vpop.f32.mrb[0].mxu0 }
 0x714   : > { %v1309_v37 = vmul.f32 0.5, %v1305_v36  ;;  %v3719_v39 = vpop.f32.mrb[1].mxu1  ;;  %v3712_v40 = vpop.f32.mrb[1].mxu0 }
 0x716   : > { %v1310_v42 = vsub.f32 %v1231_v38, %v1309_v37 }
 0x718   : > { %v1317_v43 = vadd.f32 %v3492_v41, %v1310_v42 }
 0x71a   : > { %v1319_v44 = vsel %vm1318_vm11, %v1317_v43, -inf }
 0x71b   : > { %1320 = vmax.xlane.f32.xlu0 %v1319_v44 }
 0x7a8   : > { %v1321_v45 = vpop.xlane.xlu0 %1320 }
 0x7a9   : > { %v1322_v46 = vsub.f32 %v1317_v43, %v1321_v45 }
 0x7ab   : > { %v1323_v47 = vmul.f32 1.442695, %v1322_v46 }
 0x7ad   : > { %4017 = vpow2.f32 %v1323_v47 }
 0x7b7   : > { %v4018_v48 = vpop.eup %4017 }
 0x7b8   : > { %v1325_v49 = vsel %vm1318_vm11, %v4018_v48, 0.0 }
 0x7b9   : > { %1326 = vadd.xlane.f32.xlu0 %v1325_v49 }
 0x846   : > { %v1327_v54 = vpop.xlane.xlu0 %1326 }
 0x847   : > { %4019 = vrcp.f32 %v1327_v54 }
 0x851   : > { %v4020_v55 = vpop.eup %4019 }
 0x852   : > { %v1329_v56 = vmul.f32 %v4020_v55, %v1327_v54 }
 0x854   : > { %v1330_v57 = vsub.f32 2.0, %v1329_v56 }
 0x856   : > { %v1331_v58 = vmul.f32 %v4020_v55, %v1330_v57 }
 0x858   : > { %v1332_v59 = vmul.f32 %v4018_v48, %v1331_v58 }
 0x85a   : > { %3723 = vmatmul.mubr.msk.f32.vlgmr.msra.gmra.mrb[2].mxu0 %vm1318_vm11, %v1332_v59  ;;  %3728 = vmatmul.mubr.msk.f32.vlgmr.msra.gmra.mrb[2].mxu1 %vm1318_vm11, %v1332_v59 }
 0x92d   : > { %v1406_v60 = vpop.f32.mrb[2].mxu0  ;;  %v1479_v61 = vpop.f32.mrb[2].mxu1 }
 0x92e   : > { %v1483_v62 = vmul.f32 %v1479_v61, %v4387_v25  ;;  %v3724_v63 = vpop.f32.mrb[3].mxu0  ;;  %v3729_v0 = vpop.f32.mrb[3].mxu1 }
 0x930   : > { %v1484_v1 = vsub.f32 %v1406_v60, %v1483_v62 }
 0x932   : > { %v1486_v2 = vmul.f32 0.005263158, %v1484_v1 }
 0x934   : > { %v1487_v4 = vadd.f32 %v1486_v2, %v4387_v25 }
 0x936   : > { %v1493_v5 = vadd.f32 %v1491_v3, %v1487_v4 }
 0x938   : > { %1494 = vst.msk [vmem:[#allocation2] sm:$0xff] %vm441_vm1, %v1493_v5 }
 0x939 PF: > { %s1495_s22 = sadd.s32 3, %s4289_s21  ;;  %s4150_s23 = smov 48   ;;  %vm1501_vm13 = vcmask 523648  }
 0x93a   : > { %p3497_p6 = scmp.ge.s32.totalorder %s1495_s22, 19 }
 0x93b   : > { %v3500_v8 = vld [vmem:[%s4305_s30 + $0x30] sm:$0xff] (!%p3497_p6)  ;;  %v3501_v9 = vld [vmem:[%s4305_s30 + $0x38] sm:$0xff] (!%p3497_p6)  ;;  %v4151_v11 = vmov (!%p3497_p6), 0.0|0.0   ;;  %vm4152_vm14 = vmmov (!%p3497_p6), 0   ;;  %v4153_v15 = vmov (!%p3497_p6), 0.0   ;;  %vm1674_vm15 = vcmask (!%p3497_p6), 31744  }
 0x93c   : > { %v3498_v10 = vld [vmem:[%s4300_s18 + $0x30] sm:$0xff] (!%p3497_p6)  ;;  %3871 = vmatprep.subr.bf16.mxu1 (!%p3497_p6), %v4151_v11  ;;  %3868 = vmatprep.subr.bf16.mxu0 (!%p3497_p6), %v4151_v11  ;;  %v3872_v12 = vpack.c.bf16 (!%p3497_p6), %v3501_v9, %v3500_v8  ;;  %v3499_v13 = vld [vmem:[%s4300_s18 + $0x38] sm:$0xff] (!%p3497_p6)  ;;  %v3507_v22 = vld [vmem:[%s4320_s16 + $0x3] ss:$0 sm:$0xff] (!%p3497_p6)  ;;  %vm1692_vm0 = vcmask (!%p3497_p6), 1043456   ;;  %s4154_s9 = smov (!%p3497_p6), 80  }
 0x93d   : > { %v3869_v14 = vpack.c.bf16 (!%p3497_p6), %v3499_v13, %v3498_v10  ;;  %3741 = vmatprep.mubr.msk.f32.mxu1 (!%p3497_p6), %vm4152_vm14, %v4153_v15  ;;  %3734 = vmatprep.mubr.msk.f32.mxu0 (!%p3497_p6), %vm4152_vm14, %v4153_v15  ;;  %v3503_v31 = vld [vmem:[%s4315_s24 + $0xc] sm:$0xf] (!%p3497_p6)  ;;  %v1841_v33 = vld [vmem:[%s4330_s26] sm:$0xff] (!%p3497_p6) }
 0x93e   : > { %3873 = vmatpush3.bf16.msra.mxu1 (!%p3497_p6), %v3872_v12  ;;  %v3502_v32 = vld [vmem:[%s4310_s20 + $0xc] sm:$0xf] (!%p3497_p6)  ;;  %v1844_v34 = vmul.f32 (!%p3497_p6), 0.07254762, %v1841_v33 }
 0x93f   : > { %v4412_v6 = vld [vmem:[#allocation2] sm:$0xff]  ;;  %3870 = vmatpush3.bf16.msra.mxu0 (!%p3497_p6), %v3869_v14  ;;  %3749 = vmatprep.subr.mxu1 (!%p3497_p6), %v4153_v15 }
 0x940   : > { %1498 = vrot.lane.b32.xlu0 %v4412_v6, %s4150_s23  ;;  %v1591_v16 = vmul.f32 (!%p3497_p6), %v4412_v6, %v4412_v6  ;;  %3744 = vmatprep.subr.mxu0 (!%p3497_p6), %v4153_v15 }
 0x941   : > { %1846 = vrot.lane.b32.xlu1 (!%p3497_p6), %v1844_v34, %s4154_s9 }
 0x942   : > { %3742 = vmatmul.mubr.msk.f32.vlgmr.msra.gmra.mrb[0].mxu1 (!%p3497_p6), %vm441_vm1, %v1591_v16  ;;  %3735 = vmatmul.mubr.msk.f32.vlgmr.msra.gmra.mrb[0].mxu0 (!%p3497_p6), %vm441_vm1, %v4412_v6 }
 0x943   : > { %3751 = vmatprep.mubr.msk.f32.mxu1 (!%p3497_p6), %vm4152_vm14, %v4153_v15  ;;  %3746 = vmatprep.mubr.msk.f32.mxu0 (!%p3497_p6), %vm4152_vm14, %v4153_v15 }
 0x944   : > { %3750 = vmatpush3.msk.msra.mxu1 (!%p3497_p6), %vm1692_vm0, %v3503_v31  ;;  %3745 = vmatpush3.msk.msra.mxu0 (!%p3497_p6), %vm1692_vm0, %v3502_v32 }
 0x9ad   : > { %1506 = sbr.rel (%p3497_p6) target bundleno = 3131 (0xc3b), region = 68 }
 0x9b2   : > { %v1499_v7 = vpop.permute.xlu0 %1498 }
 0x9b3   : > { %1502 = vst.msk [vmem:[%s4332_s15] sm:$0xff] %vm1501_vm13, %v1499_v7  ;;  %v1847_v48 = vpop.permute.xlu1 (!%p3497_p6), %1846 }
 0xa15   : > { %v1661_v17 = vpop.f32.mrb[0].mxu1  ;;  %v1587_v19 = vpop.f32.mrb[0].mxu0 }
 0xa16   : > { %v1665_v18 = vmul.f32 0.5, %v1661_v17  ;;  %v3743_v20 = vpop.f32.mrb[1].mxu1  ;;  %v3736_v21 = vpop.f32.mrb[1].mxu0 }
 0xa18   : > { %v1666_v23 = vsub.f32 %v1587_v19, %v1665_v18 }
 0xa1a   : > { %v1673_v24 = vadd.f32 %v3507_v22, %v1666_v23 }
 0xa1c   : > { %v1675_v25 = vsel %vm1674_vm15, %v1673_v24, -inf }
 0xa1d   : > { %1676 = vmax.xlane.f32.xlu0 %v1675_v25 }
 0xaaa   : > { %v1677_v26 = vpop.xlane.xlu0 %1676 }
 0xaab   : > { %v1678_v27 = vsub.f32 %v1673_v24, %v1677_v26 }
 0xaad   : > { %v1679_v28 = vmul.f32 1.442695, %v1678_v27 }
 0xaaf   : > { %4021 = vpow2.f32 %v1679_v28 }
 0xab9   : > { %v4022_v29 = vpop.eup %4021 }
 0xaba   : > { %v1681_v30 = vsel %vm1674_vm15, %v4022_v29, 0.0 }
 0xabb   : > { %1682 = vadd.xlane.f32.xlu0 %v1681_v30 }
 0xb48   : > { %v1683_v35 = vpop.xlane.xlu0 %1682 }
 0xb49   : > { %4023 = vrcp.f32 %v1683_v35 }
 0xb53   : > { %v4024_v36 = vpop.eup %4023 }
 0xb54   : > { %v1685_v37 = vmul.f32 %v4024_v36, %v1683_v35 }
 0xb56   : > { %v1686_v38 = vsub.f32 2.0, %v1685_v37 }
 0xb58   : > { %v1687_v39 = vmul.f32 %v4024_v36, %v1686_v38 }
 0xb5a   : > { %v1688_v40 = vmul.f32 %v4022_v29, %v1687_v39 }
 0xb5c   : > { %3747 = vmatmul.mubr.msk.f32.vlgmr.msra.gmra.mrb[2].mxu0 %vm1674_vm15, %v1688_v40  ;;  %3752 = vmatmul.mubr.msk.f32.vlgmr.msra.gmra.mrb[2].mxu1 %vm1674_vm15, %v1688_v40 }
 0xc2f   : > { %v1762_v41 = vpop.f32.mrb[2].mxu0  ;;  %v1835_v42 = vpop.f32.mrb[2].mxu1 }
 0xc30   : > { %v1839_v43 = vmul.f32 %v1835_v42, %v4412_v6  ;;  %v3748_v44 = vpop.f32.mrb[3].mxu0  ;;  %v3753_v45 = vpop.f32.mrb[3].mxu1 }
 0xc32   : > { %v1840_v46 = vsub.f32 %v1762_v41, %v1839_v43 }
 0xc34   : > { %v1842_v47 = vmul.f32 0.005263158, %v1840_v46 }
 0xc36   : > { %v1843_v49 = vadd.f32 %v1842_v47, %v4412_v6 }
 0xc38   : > { %v1849_v50 = vadd.f32 %v1847_v48, %v1843_v49 }
 0xc3a   : > { %1850 = vst.msk [vmem:[#allocation2] sm:$0xff] %vm441_vm1, %v1849_v50 }
 0xc3b PF: > { %s1851_s13 = sadd.s32 4, %s4289_s21  ;;  %s4155_s17 = smov 64   ;;  %vm1857_vm2 = vcmask 654848  }
 0xc3c   : > { %p3512_p7 = scmp.ge.s32.totalorder %s1851_s13, 19 }
 0xc3d   : > { %v3515_v53 = vld [vmem:[%s4305_s30 + $0x40] sm:$0xff] (!%p3512_p7)  ;;  %v3516_v54 = vld [vmem:[%s4305_s30 + $0x48] sm:$0xff] (!%p3512_p7)  ;;  %v4156_v56 = vmov (!%p3512_p7), 0.0|0.0   ;;  %vm4157_vm3 = vmmov (!%p3512_p7), 0   ;;  %v4158_v60 = vmov (!%p3512_p7), 0.0   ;;  %vm2030_vm4 = vcmask (!%p3512_p7), 31744  }
 0xc3e   : > { %v3513_v55 = vld [vmem:[%s4300_s18 + $0x40] sm:$0xff] (!%p3512_p7)  ;;  %3877 = vmatprep.subr.bf16.mxu1 (!%p3512_p7), %v4156_v56  ;;  %3874 = vmatprep.subr.bf16.mxu0 (!%p3512_p7), %v4156_v56  ;;  %v3878_v57 = vpack.c.bf16 (!%p3512_p7), %v3516_v54, %v3515_v53  ;;  %v3514_v58 = vld [vmem:[%s4300_s18 + $0x48] sm:$0xff] (!%p3512_p7)  ;;  %v3518_v12 = vld [vmem:[%s4315_s24 + $0x10] sm:$0xf] (!%p3512_p7)  ;;  %vm2048_vm5 = vcmask (!%p3512_p7), 1043456   ;;  %s4159_s11 = smov (!%p3512_p7), 64  }
 0xc3f   : > { %v3875_v59 = vpack.c.bf16 (!%p3512_p7), %v3514_v58, %v3513_v55  ;;  %3765 = vmatprep.mubr.msk.f32.mxu1 (!%p3512_p7), %vm4157_vm3, %v4158_v60  ;;  %3758 = vmatprep.mubr.msk.f32.mxu0 (!%p3512_p7), %vm4157_vm3, %v4158_v60  ;;  %v3522_v3 = vld [vmem:[%s4320_s16 + $0x4] ss:$0 sm:$0xff] (!%p3512_p7)  ;;  %v3517_v13 = vld [vmem:[%s4310_s20 + $0x10] sm:$0xf] (!%p3512_p7) }
 0xc40   : > { %3879 = vmatpush3.bf16.msra.mxu1 (!%p3512_p7), %v3878_v57  ;;  %v2197_v14 = vld [vmem:[%s4330_s26] sm:$0xff] (!%p3512_p7) }
 0xc41   : > { %v4437_v51 = vld [vmem:[#allocation2] sm:$0xff]  ;;  %3876 = vmatpush3.bf16.msra.mxu0 (!%p3512_p7), %v3875_v59  ;;  %3773 = vmatprep.subr.mxu1 (!%p3512_p7), %v4158_v60  ;;  %v2200_v15 = vmul.f32 (!%p3512_p7), 0.07254762, %v2197_v14 }
 0xc42   : > { %1854 = vrot.lane.b32.xlu0 %v4437_v51, %s4155_s17  ;;  %v1947_v61 = vmul.f32 (!%p3512_p7), %v4437_v51, %v4437_v51  ;;  %3768 = vmatprep.subr.mxu0 (!%p3512_p7), %v4158_v60 }
 0xc43   : > { %2202 = vrot.lane.b32.xlu1 (!%p3512_p7), %v2200_v15, %s4159_s11 }
 0xc44   : > { %3766 = vmatmul.mubr.msk.f32.vlgmr.msra.gmra.mrb[0].mxu1 (!%p3512_p7), %vm441_vm1, %v1947_v61  ;;  %3759 = vmatmul.mubr.msk.f32.vlgmr.msra.gmra.mrb[0].mxu0 (!%p3512_p7), %vm441_vm1, %v4437_v51 }
 0xc45   : > { %3775 = vmatprep.mubr.msk.f32.mxu1 (!%p3512_p7), %vm4157_vm3, %v4158_v60  ;;  %3770 = vmatprep.mubr.msk.f32.mxu0 (!%p3512_p7), %vm4157_vm3, %v4158_v60 }
 0xc46   : > { %3774 = vmatpush3.msk.msra.mxu1 (!%p3512_p7), %vm2048_vm5, %v3518_v12  ;;  %3769 = vmatpush3.msk.msra.mxu0 (!%p3512_p7), %vm2048_vm5, %v3517_v13 }
 0xcaf   : > { %1862 = sbr.rel (%p3512_p7) target bundleno = 3901 (0xf3d), region = 72 }
 0xcb4   : > { %v1855_v52 = vpop.permute.xlu0 %1854 }
 0xcb5   : > { %1858 = vst.msk [vmem:[%s4332_s15] sm:$0xff] %vm1857_vm2, %v1855_v52  ;;  %v2203_v29 = vpop.permute.xlu1 (!%p3512_p7), %2202 }
 0xd17   : > { %v2017_v62 = vpop.f32.mrb[0].mxu1  ;;  %v1943_v0 = vpop.f32.mrb[0].mxu0 }
 0xd18   : > { %v2021_v63 = vmul.f32 0.5, %v2017_v62  ;;  %v3767_v1 = vpop.f32.mrb[1].mxu1  ;;  %v3760_v2 = vpop.f32.mrb[1].mxu0 }
 0xd1a   : > { %v2022_v4 = vsub.f32 %v1943_v0, %v2021_v63 }
 0xd1c   : > { %v2029_v5 = vadd.f32 %v3522_v3, %v2022_v4 }
 0xd1e   : > { %v2031_v6 = vsel %vm2030_vm4, %v2029_v5, -inf }
 0xd1f   : > { %2032 = vmax.xlane.f32.xlu0 %v2031_v6 }
 0xdac   : > { %v2033_v7 = vpop.xlane.xlu0 %2032 }
 0xdad   : > { %v2034_v8 = vsub.f32 %v2029_v5, %v2033_v7 }
 0xdaf   : > { %v2035_v9 = vmul.f32 1.442695, %v2034_v8 }
 0xdb1   : > { %4025 = vpow2.f32 %v2035_v9 }
 0xdbb   : > { %v4026_v10 = vpop.eup %4025 }
 0xdbc   : > { %v2037_v11 = vsel %vm2030_vm4, %v4026_v10, 0.0 }
 0xdbd   : > { %2038 = vadd.xlane.f32.xlu0 %v2037_v11 }
 0xe4a   : > { %v2039_v16 = vpop.xlane.xlu0 %2038 }
 0xe4b   : > { %4027 = vrcp.f32 %v2039_v16 }
 0xe55   : > { %v4028_v17 = vpop.eup %4027 }
 0xe56   : > { %v2041_v18 = vmul.f32 %v4028_v17, %v2039_v16 }
 0xe58   : > { %v2042_v19 = vsub.f32 2.0, %v2041_v18 }
 0xe5a   : > { %v2043_v20 = vmul.f32 %v4028_v17, %v2042_v19 }
 0xe5c   : > { %v2044_v21 = vmul.f32 %v4026_v10, %v2043_v20 }
 0xe5e   : > { %3771 = vmatmul.mubr.msk.f32.vlgmr.msra.gmra.mrb[2].mxu0 %vm2030_vm4, %v2044_v21  ;;  %3776 = vmatmul.mubr.msk.f32.vlgmr.msra.gmra.mrb[2].mxu1 %vm2030_vm4, %v2044_v21 }
 0xf31   : > { %v2118_v22 = vpop.f32.mrb[2].mxu0  ;;  %v2191_v23 = vpop.f32.mrb[2].mxu1 }
 0xf32   : > { %v2195_v24 = vmul.f32 %v2191_v23, %v4437_v51  ;;  %v3772_v25 = vpop.f32.mrb[3].mxu0  ;;  %v3777_v26 = vpop.f32.mrb[3].mxu1 }
 0xf34   : > { %v2196_v27 = vsub.f32 %v2118_v22, %v2195_v24 }
 0xf36   : > { %v2198_v28 = vmul.f32 0.005263158, %v2196_v27 }
 0xf38   : > { %v2199_v30 = vadd.f32 %v2198_v28, %v4437_v51 }
 0xf3a   : > { %v2205_v31 = vadd.f32 %v2203_v29, %v2199_v30 }
 0xf3c   : > { %2206 = vst.msk [vmem:[#allocation2] sm:$0xff] %vm441_vm1, %v2205_v31 }
 0xf3d PF: > { %s2207_s12 = sadd.s32 5, %s4289_s21  ;;  %s4160_s10 = smov 80   ;;  %vm2213_vm6 = vcmask 786048  }
 0xf3e   : > { %p3527_p9 = scmp.ge.s32.totalorder %s2207_s12, 19 }
 0xf3f   : > { %v3530_v34 = vld [vmem:[%s4305_s30 + $0x50] sm:$0xff] (!%p3527_p9)  ;;  %v3531_v35 = vld [vmem:[%s4305_s30 + $0x58] sm:$0xff] (!%p3527_p9)  ;;  %v4161_v37 = vmov (!%p3527_p9), 0.0|0.0   ;;  %vm4162_vm7 = vmmov (!%p3527_p9), 0   ;;  %v4163_v41 = vmov (!%p3527_p9), 0.0   ;;  %vm2386_vm8 = vcmask (!%p3527_p9), 31744  }
 0xf40   : > { %v3528_v36 = vld [vmem:[%s4300_s18 + $0x50] sm:$0xff] (!%p3527_p9)  ;;  %3883 = vmatprep.subr.bf16.mxu1 (!%p3527_p9), %v4161_v37  ;;  %3880 = vmatprep.subr.bf16.mxu0 (!%p3527_p9), %v4161_v37  ;;  %v3884_v38 = vpack.c.bf16 (!%p3527_p9), %v3531_v35, %v3530_v34  ;;  %v3529_v39 = vld [vmem:[%s4300_s18 + $0x58] sm:$0xff] (!%p3527_p9)  ;;  %v3537_v48 = vld [vmem:[%s4320_s16 + $0x5] ss:$0 sm:$0xff] (!%p3527_p9)  ;;  %vm2404_vm9 = vcmask (!%p3527_p9), 1043456   ;;  %s4164_s29 = smov (!%p3527_p9), 48  }
 0xf41   : > { %v3881_v40 = vpack.c.bf16 (!%p3527_p9), %v3529_v39, %v3528_v36  ;;  %3789 = vmatprep.mubr.msk.f32.mxu1 (!%p3527_p9), %vm4162_vm7, %v4163_v41  ;;  %3782 = vmatprep.mubr.msk.f32.mxu0 (!%p3527_p9), %vm4162_vm7, %v4163_v41  ;;  %v3533_v57 = vld [vmem:[%s4315_s24 + $0x14] sm:$0xf] (!%p3527_p9)  ;;  %v2553_v59 = vld [vmem:[%s4330_s26] sm:$0xff] (!%p3527_p9) }
 0xf42   : > { %3885 = vmatpush3.bf16.msra.mxu1 (!%p3527_p9), %v3884_v38  ;;  %v3532_v58 = vld [vmem:[%s4310_s20 + $0x14] sm:$0xf] (!%p3527_p9)  ;;  %v2556_v60 = vmul.f32 (!%p3527_p9), 0.07254762, %v2553_v59 }
 0xf43   : > { %v4462_v32 = vld [vmem:[#allocation2] sm:$0xff]  ;;  %3882 = vmatpush3.bf16.msra.mxu0 (!%p3527_p9), %v3881_v40  ;;  %3797 = vmatprep.subr.mxu1 (!%p3527_p9), %v4163_v41 }
 0xf44   : > { %2210 = vrot.lane.b32.xlu0 %v4462_v32, %s4160_s10  ;;  %v2303_v42 = vmul.f32 (!%p3527_p9), %v4462_v32, %v4462_v32  ;;  %3792 = vmatprep.subr.mxu0 (!%p3527_p9), %v4163_v41 }
 0xf45   : > { %2558 = vrot.lane.b32.xlu1 (!%p3527_p9), %v2556_v60, %s4164_s29 }
 0xf46   : > { %3790 = vmatmul.mubr.msk.f32.vlgmr.msra.gmra.mrb[0].mxu1 (!%p3527_p9), %vm441_vm1, %v2303_v42  ;;  %3783 = vmatmul.mubr.msk.f32.vlgmr.msra.gmra.mrb[0].mxu0 (!%p3527_p9), %vm441_vm1, %v4462_v32 }
 0xf47   : > { %3799 = vmatprep.mubr.msk.f32.mxu1 (!%p3527_p9), %vm4162_vm7, %v4163_v41  ;;  %3794 = vmatprep.mubr.msk.f32.mxu0 (!%p3527_p9), %vm4162_vm7, %v4163_v41 }
 0xf48   : > { %3798 = vmatpush3.msk.msra.mxu1 (!%p3527_p9), %vm2404_vm9, %v3533_v57  ;;  %3793 = vmatpush3.msk.msra.mxu0 (!%p3527_p9), %vm2404_vm9, %v3532_v58 }
 0xfb1   : > { %2218 = sbr.rel (%p3527_p9) target bundleno = 4671 (0x123f), region = 76 }
 0xfb6   : > { %v2211_v33 = vpop.permute.xlu0 %2210 }
 0xfb7   : > { %2214 = vst.msk [vmem:[%s4332_s15] sm:$0xff] %vm2213_vm6, %v2211_v33  ;;  %v2559_v10 = vpop.permute.xlu1 (!%p3527_p9), %2558 }
0x1019   : > { %v2373_v43 = vpop.f32.mrb[0].mxu1  ;;  %v2299_v45 = vpop.f32.mrb[0].mxu0 }
0x101a   : > { %v2377_v44 = vmul.f32 0.5, %v2373_v43  ;;  %v3791_v46 = vpop.f32.mrb[1].mxu1  ;;  %v3784_v47 = vpop.f32.mrb[1].mxu0 }
0x101c   : > { %v2378_v49 = vsub.f32 %v2299_v45, %v2377_v44 }
0x101e   : > { %v2385_v50 = vadd.f32 %v3537_v48, %v2378_v49 }
0x1020   : > { %v2387_v51 = vsel %vm2386_vm8, %v2385_v50, -inf }
0x1021   : > { %2388 = vmax.xlane.f32.xlu0 %v2387_v51 }
0x10ae   : > { %v2389_v52 = vpop.xlane.xlu0 %2388 }
0x10af   : > { %v2390_v53 = vsub.f32 %v2385_v50, %v2389_v52 }
0x10b1   : > { %v2391_v54 = vmul.f32 1.442695, %v2390_v53 }
0x10b3   : > { %4029 = vpow2.f32 %v2391_v54 }
0x10bd   : > { %v4030_v55 = vpop.eup %4029 }
0x10be   : > { %v2393_v56 = vsel %vm2386_vm8, %v4030_v55, 0.0 }
0x10bf   : > { %2394 = vadd.xlane.f32.xlu0 %v2393_v56 }
0x114c   : > { %v2395_v61 = vpop.xlane.xlu0 %2394 }
0x114d   : > { %4031 = vrcp.f32 %v2395_v61 }
0x1157   : > { %v4032_v62 = vpop.eup %4031 }
0x1158   : > { %v2397_v63 = vmul.f32 %v4032_v62, %v2395_v61 }
0x115a   : > { %v2398_v0 = vsub.f32 2.0, %v2397_v63 }
0x115c   : > { %v2399_v1 = vmul.f32 %v4032_v62, %v2398_v0 }
0x115e   : > { %v2400_v2 = vmul.f32 %v4030_v55, %v2399_v1 }
0x1160   : > { %3795 = vmatmul.mubr.msk.f32.vlgmr.msra.gmra.mrb[2].mxu0 %vm2386_vm8, %v2400_v2  ;;  %3800 = vmatmul.mubr.msk.f32.vlgmr.msra.gmra.mrb[2].mxu1 %vm2386_vm8, %v2400_v2 }
0x1233   : > { %v2474_v3 = vpop.f32.mrb[2].mxu0  ;;  %v2547_v4 = vpop.f32.mrb[2].mxu1 }
0x1234   : > { %v2551_v5 = vmul.f32 %v2547_v4, %v4462_v32  ;;  %v3796_v6 = vpop.f32.mrb[3].mxu0  ;;  %v3801_v7 = vpop.f32.mrb[3].mxu1 }
0x1236   : > { %v2552_v8 = vsub.f32 %v2474_v3, %v2551_v5 }
0x1238   : > { %v2554_v9 = vmul.f32 0.005263158, %v2552_v8 }
0x123a   : > { %v2555_v11 = vadd.f32 %v2554_v9, %v4462_v32 }
0x123c   : > { %v2561_v12 = vadd.f32 %v2559_v10, %v2555_v11 }
0x123e   : > { %2562 = vst.msk [vmem:[#allocation2] sm:$0xff] %vm441_vm1, %v2561_v12 }
0x123f PF: > { %s2563_s19 = sadd.s32 6, %s4289_s21  ;;  %s4165_s0 = smov 96   ;;  %vm2569_vm10 = vcmask 917248  }
0x1240   : > { %p3542_p10 = scmp.ge.s32.totalorder %s2563_s19, 19 }
0x1241   : > { %v3545_v15 = vld [vmem:[%s4305_s30 + $0x60] sm:$0xff] (!%p3542_p10)  ;;  %v3546_v16 = vld [vmem:[%s4305_s30 + $0x68] sm:$0xff] (!%p3542_p10)  ;;  %v4166_v18 = vmov (!%p3542_p10), 0.0|0.0   ;;  %vm4167_vm11 = vmmov (!%p3542_p10), 0   ;;  %v4168_v22 = vmov (!%p3542_p10), 0.0   ;;  %vm2742_vm12 = vcmask (!%p3542_p10), 31744  }
0x1242   : > { %v3543_v17 = vld [vmem:[%s4300_s18 + $0x60] sm:$0xff] (!%p3542_p10)  ;;  %3889 = vmatprep.subr.bf16.mxu1 (!%p3542_p10), %v4166_v18  ;;  %3886 = vmatprep.subr.bf16.mxu0 (!%p3542_p10), %v4166_v18  ;;  %v3890_v19 = vpack.c.bf16 (!%p3542_p10), %v3546_v16, %v3545_v15  ;;  %v3544_v20 = vld [vmem:[%s4300_s18 + $0x68] sm:$0xff] (!%p3542_p10)  ;;  %v3548_v38 = vld [vmem:[%s4315_s24 + $0x18] sm:$0xf] (!%p3542_p10)  ;;  %vm2760_vm13 = vcmask (!%p3542_p10), 1043456   ;;  %s4169_s1 = smov (!%p3542_p10), 32  }
0x1243   : > { %v3887_v21 = vpack.c.bf16 (!%p3542_p10), %v3544_v20, %v3543_v17  ;;  %3813 = vmatprep.mubr.msk.f32.mxu1 (!%p3542_p10), %vm4167_vm11, %v4168_v22  ;;  %3806 = vmatprep.mubr.msk.f32.mxu0 (!%p3542_p10), %vm4167_vm11, %v4168_v22  ;;  %v3552_v29 = vld [vmem:[%s4320_s16 + $0x6] ss:$0 sm:$0xff] (!%p3542_p10)  ;;  %v3547_v39 = vld [vmem:[%s4310_s20 + $0x18] sm:$0xf] (!%p3542_p10) }
0x1244   : > { %3891 = vmatpush3.bf16.msra.mxu1 (!%p3542_p10), %v3890_v19  ;;  %v2909_v40 = vld [vmem:[%s4330_s26] sm:$0xff] (!%p3542_p10) }
0x1245   : > { %v4487_v13 = vld [vmem:[#allocation2] sm:$0xff]  ;;  %3888 = vmatpush3.bf16.msra.mxu0 (!%p3542_p10), %v3887_v21  ;;  %3821 = vmatprep.subr.mxu1 (!%p3542_p10), %v4168_v22  ;;  %v2912_v41 = vmul.f32 (!%p3542_p10), 0.07254762, %v2909_v40 }
0x1246   : > { %2566 = vrot.lane.b32.xlu0 %v4487_v13, %s4165_s0  ;;  %v2659_v23 = vmul.f32 (!%p3542_p10), %v4487_v13, %v4487_v13  ;;  %3816 = vmatprep.subr.mxu0 (!%p3542_p10), %v4168_v22 }
0x1247   : > { %2914 = vrot.lane.b32.xlu1 (!%p3542_p10), %v2912_v41, %s4169_s1 }
0x1248   : > { %3814 = vmatmul.mubr.msk.f32.vlgmr.msra.gmra.mrb[0].mxu1 (!%p3542_p10), %vm441_vm1, %v2659_v23  ;;  %3807 = vmatmul.mubr.msk.f32.vlgmr.msra.gmra.mrb[0].mxu0 (!%p3542_p10), %vm441_vm1, %v4487_v13 }
0x1249   : > { %3823 = vmatprep.mubr.msk.f32.mxu1 (!%p3542_p10), %vm4167_vm11, %v4168_v22  ;;  %3818 = vmatprep.mubr.msk.f32.mxu0 (!%p3542_p10), %vm4167_vm11, %v4168_v22 }
0x124a   : > { %3822 = vmatpush3.msk.msra.mxu1 (!%p3542_p10), %vm2760_vm13, %v3548_v38  ;;  %3817 = vmatpush3.msk.msra.mxu0 (!%p3542_p10), %vm2760_vm13, %v3547_v39 }
0x12b3   : > { %2574 = sbr.rel (%p3542_p10) target bundleno = 5441 (0x1541), region = 80 }
0x12b8   : > { %v2567_v14 = vpop.permute.xlu0 %2566 }
0x12b9   : > { %2570 = vst.msk [vmem:[%s4332_s15] sm:$0xff] %vm2569_vm10, %v2567_v14  ;;  %v2915_v55 = vpop.permute.xlu1 (!%p3542_p10), %2914 }
0x131b   : > { %v2729_v24 = vpop.f32.mrb[0].mxu1  ;;  %v2655_v26 = vpop.f32.mrb[0].mxu0 }
0x131c   : > { %v2733_v25 = vmul.f32 0.5, %v2729_v24  ;;  %v3815_v27 = vpop.f32.mrb[1].mxu1  ;;  %v3808_v28 = vpop.f32.mrb[1].mxu0 }
0x131e   : > { %v2734_v30 = vsub.f32 %v2655_v26, %v2733_v25 }
0x1320   : > { %v2741_v31 = vadd.f32 %v3552_v29, %v2734_v30 }
0x1322   : > { %v2743_v32 = vsel %vm2742_vm12, %v2741_v31, -inf }
0x1323   : > { %2744 = vmax.xlane.f32.xlu0 %v2743_v32 }
0x13b0   : > { %v2745_v33 = vpop.xlane.xlu0 %2744 }
0x13b1   : > { %v2746_v34 = vsub.f32 %v2741_v31, %v2745_v33 }
0x13b3   : > { %v2747_v35 = vmul.f32 1.442695, %v2746_v34 }
0x13b5   : > { %4033 = vpow2.f32 %v2747_v35 }
0x13bf   : > { %v4034_v36 = vpop.eup %4033 }
0x13c0   : > { %v2749_v37 = vsel %vm2742_vm12, %v4034_v36, 0.0 }
0x13c1   : > { %2750 = vadd.xlane.f32.xlu0 %v2749_v37 }
0x144e   : > { %v2751_v42 = vpop.xlane.xlu0 %2750 }
0x144f   : > { %4035 = vrcp.f32 %v2751_v42 }
0x1459   : > { %v4036_v43 = vpop.eup %4035 }
0x145a   : > { %v2753_v44 = vmul.f32 %v4036_v43, %v2751_v42 }
0x145c   : > { %v2754_v45 = vsub.f32 2.0, %v2753_v44 }
0x145e   : > { %v2755_v46 = vmul.f32 %v4036_v43, %v2754_v45 }
0x1460   : > { %v2756_v47 = vmul.f32 %v4034_v36, %v2755_v46 }
0x1462   : > { %3819 = vmatmul.mubr.msk.f32.vlgmr.msra.gmra.mrb[2].mxu0 %vm2742_vm12, %v2756_v47  ;;  %3824 = vmatmul.mubr.msk.f32.vlgmr.msra.gmra.mrb[2].mxu1 %vm2742_vm12, %v2756_v47 }
0x1535   : > { %v2830_v48 = vpop.f32.mrb[2].mxu0  ;;  %v2903_v49 = vpop.f32.mrb[2].mxu1 }
0x1536   : > { %v2907_v50 = vmul.f32 %v2903_v49, %v4487_v13  ;;  %v3820_v51 = vpop.f32.mrb[3].mxu0  ;;  %v3825_v52 = vpop.f32.mrb[3].mxu1 }
0x1538   : > { %v2908_v53 = vsub.f32 %v2830_v48, %v2907_v50 }
0x153a   : > { %v2910_v54 = vmul.f32 0.005263158, %v2908_v53 }
0x153c   : > { %v2911_v56 = vadd.f32 %v2910_v54, %v4487_v13 }
0x153e   : > { %v2917_v57 = vadd.f32 %v2915_v55, %v2911_v56 }
0x1540   : > { %2918 = vst.msk [vmem:[#allocation2] sm:$0xff] %vm441_vm1, %v2917_v57 }
0x1541 PF: > { %s2919_s2 = sadd.s32 7, %s4289_s21  ;;  %s4170_s7 = smov 112   ;;  %vm2925_vm14 = vcmask 1048448  }
0x1542   : > { %p3557_p11 = scmp.ge.s32.totalorder %s2919_s2, 19 }
0x1543   : > { %v3560_v60 = vld [vmem:[%s4305_s30 + $0x70] sm:$0xff] (!%p3557_p11)  ;;  %v3561_v61 = vld [vmem:[%s4305_s30 + $0x78] sm:$0xff] (!%p3557_p11)  ;;  %v4171_v63 = vmov (!%p3557_p11), 0.0|0.0   ;;  %vm4172_vm15 = vmmov (!%p3557_p11), 0   ;;  %v4173_v3 = vmov (!%p3557_p11), 0.0   ;;  %vm3098_vm0 = vcmask (!%p3557_p11), 31744  }
0x1544   : > { %v3558_v62 = vld [vmem:[%s4300_s18 + $0x70] sm:$0xff] (!%p3557_p11)  ;;  %3895 = vmatprep.subr.bf16.mxu1 (!%p3557_p11), %v4171_v63  ;;  %3892 = vmatprep.subr.bf16.mxu0 (!%p3557_p11), %v4171_v63  ;;  %v3896_v0 = vpack.c.bf16 (!%p3557_p11), %v3561_v61, %v3560_v60  ;;  %v3559_v1 = vld [vmem:[%s4300_s18 + $0x78] sm:$0xff] (!%p3557_p11)  ;;  %v3567_v10 = vld [vmem:[%s4320_s16 + $0x7] ss:$0 sm:$0xff] (!%p3557_p11)  ;;  %vm3116_vm2 = vcmask (!%p3557_p11), 1043456   ;;  %s4174_s30 = smov (!%p3557_p11), 16  }
0x1545   : > { %v3893_v2 = vpack.c.bf16 (!%p3557_p11), %v3559_v1, %v3558_v62  ;;  %3837 = vmatprep.mubr.msk.f32.mxu1 (!%p3557_p11), %vm4172_vm15, %v4173_v3  ;;  %3830 = vmatprep.mubr.msk.f32.mxu0 (!%p3557_p11), %vm4172_vm15, %v4173_v3  ;;  %v3563_v19 = vld [vmem:[%s4315_s24 + $0x1c] sm:$0xf] (!%p3557_p11)  ;;  %v3265_v21 = vld [vmem:[%s4330_s26] sm:$0xff] (!%p3557_p11) }
0x1546   : > { %3897 = vmatpush3.bf16.msra.mxu1 (!%p3557_p11), %v3896_v0  ;;  %v3562_v20 = vld [vmem:[%s4310_s20 + $0x1c] sm:$0xf] (!%p3557_p11)  ;;  %v3268_v22 = vmul.f32 (!%p3557_p11), 0.07254762, %v3265_v21 }
0x1547   : > { %v4512_v58 = vld [vmem:[#allocation2] sm:$0xff]  ;;  %3894 = vmatpush3.bf16.msra.mxu0 (!%p3557_p11), %v3893_v2  ;;  %3845 = vmatprep.subr.mxu1 (!%p3557_p11), %v4173_v3 }
0x1548   : > { %2922 = vrot.lane.b32.xlu0 %v4512_v58, %s4170_s7  ;;  %v3015_v4 = vmul.f32 (!%p3557_p11), %v4512_v58, %v4512_v58  ;;  %3840 = vmatprep.subr.mxu0 (!%p3557_p11), %v4173_v3 }
0x1549   : > { %3270 = vrot.lane.b32.xlu1 (!%p3557_p11), %v3268_v22, %s4174_s30 }
0x154a   : > { %3838 = vmatmul.mubr.msk.f32.vlgmr.msra.gmra.mrb[0].mxu1 (!%p3557_p11), %vm441_vm1, %v3015_v4  ;;  %3831 = vmatmul.mubr.msk.f32.vlgmr.msra.gmra.mrb[0].mxu0 (!%p3557_p11), %vm441_vm1, %v4512_v58 }
0x154b   : > { %3847 = vmatprep.mubr.msk.f32.mxu1 (!%p3557_p11), %vm4172_vm15, %v4173_v3  ;;  %3842 = vmatprep.mubr.msk.f32.mxu0 (!%p3557_p11), %vm4172_vm15, %v4173_v3 }
0x154c   : > { %3846 = vmatpush3.msk.msra.mxu1 (!%p3557_p11), %vm3116_vm2, %v3563_v19  ;;  %3841 = vmatpush3.msk.msra.mxu0 (!%p3557_p11), %vm3116_vm2, %v3562_v20 }
0x15b5   : > { %2930 = sbr.rel (%p3557_p11) target bundleno = 6211 (0x1843), region = 84 }
0x15ba   : > { %v2923_v59 = vpop.permute.xlu0 %2922 }
0x15bb   : > { %2926 = vst.msk [vmem:[%s4332_s15] sm:$0xff] %vm2925_vm14, %v2923_v59  ;;  %v3271_v36 = vpop.permute.xlu1 (!%p3557_p11), %3270 }
0x161d   : > { %v3085_v5 = vpop.f32.mrb[0].mxu1  ;;  %v3011_v7 = vpop.f32.mrb[0].mxu0 }
0x161e   : > { %v3089_v6 = vmul.f32 0.5, %v3085_v5  ;;  %v3839_v8 = vpop.f32.mrb[1].mxu1  ;;  %v3832_v9 = vpop.f32.mrb[1].mxu0 }
0x1620   : > { %v3090_v11 = vsub.f32 %v3011_v7, %v3089_v6 }
0x1622   : > { %v3097_v12 = vadd.f32 %v3567_v10, %v3090_v11 }
0x1624   : > { %v3099_v13 = vsel %vm3098_vm0, %v3097_v12, -inf }
0x1625   : > { %3100 = vmax.xlane.f32.xlu0 %v3099_v13 }
0x16b2   : > { %v3101_v14 = vpop.xlane.xlu0 %3100 }
0x16b3   : > { %v3102_v15 = vsub.f32 %v3097_v12, %v3101_v14 }
0x16b5   : > { %v3103_v16 = vmul.f32 1.442695, %v3102_v15 }
0x16b7   : > { %4037 = vpow2.f32 %v3103_v16 }
0x16c1   : > { %v4038_v17 = vpop.eup %4037 }
0x16c2   : > { %v3105_v18 = vsel %vm3098_vm0, %v4038_v17, 0.0 }
0x16c3   : > { %3106 = vadd.xlane.f32.xlu0 %v3105_v18 }
0x1750   : > { %v3107_v23 = vpop.xlane.xlu0 %3106 }
0x1751   : > { %4039 = vrcp.f32 %v3107_v23 }
0x175b   : > { %v4040_v24 = vpop.eup %4039 }
0x175c   : > { %v3109_v25 = vmul.f32 %v4040_v24, %v3107_v23 }
0x175e   : > { %v3110_v26 = vsub.f32 2.0, %v3109_v25 }
0x1760   : > { %v3111_v27 = vmul.f32 %v4040_v24, %v3110_v26 }
0x1762   : > { %v3112_v28 = vmul.f32 %v4038_v17, %v3111_v27 }
0x1764   : > { %3843 = vmatmul.mubr.msk.f32.vlgmr.msra.gmra.mrb[2].mxu0 %vm3098_vm0, %v3112_v28  ;;  %3848 = vmatmul.mubr.msk.f32.vlgmr.msra.gmra.mrb[2].mxu1 %vm3098_vm0, %v3112_v28 }
0x1837   : > { %v3186_v29 = vpop.f32.mrb[2].mxu0  ;;  %v3259_v30 = vpop.f32.mrb[2].mxu1 }
0x1838   : > { %v3263_v31 = vmul.f32 %v3259_v30, %v4512_v58  ;;  %v3844_v32 = vpop.f32.mrb[3].mxu0  ;;  %v3849_v33 = vpop.f32.mrb[3].mxu1 }
0x183a   : > { %v3264_v34 = vsub.f32 %v3186_v29, %v3263_v31 }
0x183c   : > { %v3266_v35 = vmul.f32 0.005263158, %v3264_v34 }
0x183e   : > { %v3267_v37 = vadd.f32 %v3266_v35, %v4512_v58 }
0x1840   : > { %v3273_v38 = vadd.f32 %v3271_v36, %v3267_v37 }
0x1842   : > { %3274 = vst.msk [vmem:[#allocation2] sm:$0xff] %vm441_vm1, %v3273_v38 }
0x1843 PF: > { %s3899_s20 = smul.u32 3, %s4123_s28  ;;  %s3291_s21 = sshll.u32 %s4332_s15, 4  ;;  %s4539_s21 = int_to_ptr.vmem [resolvable:$true] %s3291_s21 }
0x1844   : > { %s4631_s14 = sld [smem:[#allocation19_spill]]  ;;  %s4632_s23 = sand.u32 1, %s4111_s25  }
0x1845   : > { %s3287_s18 = sadd.s32 %s4119_s27, %s3899_s20  ;;  %s3276_s9 = scalar_lea.sflag [#allocation4], %s4632_s23 }
0x1846   : > { %s3573_s16 = sshll.u32 %s3287_s18, 7  ;;  %s4041_s13 = scalar_lea.vmem %s4539_s21, 128 }
0x1847   : > { %p4042_p12 = scmp.ne.s32.totalorder %s4539_s21, %s4041_s13  ;;  %s4175_s28 = smov [#allocation3]  }
0x1848   : > { %s4045_s15 = sshll.u32 %s4175_s28, 4  ;;  %s4046_s15 = int_to_ptr.vmem [resolvable:$false] %s4045_s15 }
0x1849   : > { %p4043_p13 = pnand %p4042_p12, %p4267_p3  ;;  %s4047_s27 = scalar_lea.vmem %s4046_s15, 256 }
0x184a   : > { %s3289_s22 = scalar_lea.hbm %s4631_s14, %s3573_s16  ;;  %p4048_p1 = scmp.lt.s32.totalorder %s4539_s21, %s4046_s15 }
0x184b   : > { %p4044_p0 = pneg %p4043_p13  ;;  %p4049_p2 = scmp.lt.s32.totalorder %s4047_s27, %s4041_s13 }
0x184d   : > { %p4050_p4 = por %p4049_p2, %p4048_p1 }
0x184f   : > { %p4051_p5 = pnand %p4050_p4, %p4044_p0 }
0x1851   : > { %4054 = shalt.err (!%p4051_p5)
}
0x1852   : > { %s4055_s17 = scalar_lea.hbm %s3289_s22, 128  ;;  %s4059_s10 = scalar_lea.hbm %s4631_s14, 768 }
0x1853   : > { %p4056_p6 = scmp.ne.s32.totalorder %s3289_s22, %s4055_s17  ;;  %p4060_p10 = scmp.lt.u32.totalorder %s3289_s22, %s4631_s14 }
0x1854   : > { %p4061_p11 = scmp.lt.u32.totalorder %s4059_s10, %s4055_s17  ;;  %p4063_p13 = scmp.lt.u32.totalorder %s4055_s17, %s3289_s22 }
0x1855   : > { %p4057_p7 = pnand %p4056_p6, %p4267_p3 }
0x1856   : > { %p4062_p12 = por %p4061_p11, %p4060_p10 }
0x1857   : > { %p4058_p9 = pneg %p4057_p7 }
0x1858   : > { %p4064_p1 = por %p4063_p13, %p4062_p12 }
0x185a   : > { %p4065_p0 = pnand %p4064_p1, %p4058_p9 }
0x185c   : > { %4068 = shalt.err (!%p4065_p0)
}
0x185d   : > { %3900 = dma.vmem_to_hbm [thread:$0]  (%p4267_p3), %s4539_s21, 128, %s3289_s22, %s3276_s9  }
0x185e PF: > { %s4633_s0 = sld [smem:[#allocation10_spill]]  ;;  %s4634_s1 = sld [smem:[#allocation6_spill]] }
0x1864   : > { %p3906_p2 = scmp.ge.s32.totalorder %s4633_s0, 2  ;;  %s3303_s7 = sand.u32 1, %s4634_s1  }
0x1865   : > { %s3304_s30 = scalar_lea.sflag [#allocation4], %s3303_s7 }
0x1866   : > { %p3903_p4 = pnand %p3906_p2, %p4276_p8 }
0x1868   : > { %4102 = dma.done.wait (!%p3903_p4), %s3304_s30, 128  }
0x1869   : > { %4104 = vsyncadd (!%p3903_p4), %s3304_s30, 4294967168  ;;  %s20_s8 = sadd.s32 1, %s4633_s0   ;;  %s4636_s20 = sld [smem:[#allocation7_spill]] }
0x186a   : > { %p17_p5 = scmp.ge.s32.totalorder %s20_s8, 8   ;;  %s4637_s26 = sld [smem:[#allocation15_spill]] }
0x186b   : > { %s4638_s27 = sld [smem:[#allocation8_spill]]  ;;  %s4639_s28 = sld [smem:[#allocation9_spill]] }
0x186c   : > { %s4640_s29 = sld [smem:[#allocation11_spill]]  ;;  %s4641_s30 = sld [smem:[#allocation13_spill]] }
0x186d   : > { %s4642_s24 = smov %s4111_s25  ;;  %19 = sbr.rel (!%p17_p5) target bundleno = 10 (0xa), region = 172 }
0x186f   : > { %s4643_s25 = smov %s4636_s20 }
0x1874   :  { %3309 = vsyncpa [#allocation4], 1 }
0x1875   :  { %3311 = vsyncpa [#allocation4 + $0x1], 1 }

</bundles_post_ra>
